<compile_context>
chip_gen: v7x
topology: tpu7x:2x2x1
jax: 0.10.0
libtpu: 0.0.40
codegen_flags: <defaults>
</compile_context>

<pallas_src>
import jax
import jax.numpy as jnp
from jax import lax
from jax.experimental import pallas as pl
from jax.experimental.pallas import tpu as pltpu
import numpy as np


def _round_up(x, m):
    return ((x + m - 1) // m) * m


def gru_head_kernel(emb_ref, wih_ref, whh_ref, bih_ref, bhn_ref,
                    wfc_ref, bfc_ref, out_ref, gi_scr):
    """GRU recurrence + seq-sum + tanh + fc + log_softmax for one batch tile.

    emb_ref : (1, T*TILE_B, E)     bf16  time-major flattened embeddings
    wih_ref : (E, 3*H_P)           bf16  input->gate weights, gate-major (r,z,n)
    whh_ref : (H_P, 3*H_P)         bf16  hidden->gate weights, gate-major
    bih_ref : (1, 3*H_P)           f32   b_ih with b_hr/b_hz folded in
    bhn_ref : (1, H_P)             f32   n-gate hidden bias (inside r*(.))
    wfc_ref : (H_P, C_P)           bf16
    bfc_ref : (1, C_P)             f32   (padded class lanes biased to -1e9)
    out_ref : (TILE_B, C_P)        f32   log_softmax output
    gi_scr  : (T*TILE_B, 3*H_P)    f32   precomputed input-side gate pre-acts
    """
    TILE_B, C_P = out_ref.shape
    H_P = whh_ref.shape[0]
    T = emb_ref.shape[1] // TILE_B

    # --- Preamble: all input-side gate matmuls as ONE large MXU op ----------
    gi_scr[...] = jnp.dot(emb_ref[0], wih_ref[...],
                          preferred_element_type=jnp.float32) + bih_ref[...]

    # Loop-invariants hoisted out of the (unrolled) recurrence.
    whh = whh_ref[...]                                      # (H_P, 3*H_P) bf16
    b_hn = jnp.broadcast_to(bhn_ref[...], (TILE_B, H_P))    # hoisted broadcast

    h0 = jnp.zeros((TILE_B, H_P), jnp.float32)
    acc0 = jnp.zeros((TILE_B, H_P), jnp.float32)

    def step(t, carry):
        # h / acc live in vregs across the loop: no per-step VMEM round trip.
        h, acc = carry
        row = pl.multiple_of(t * TILE_B, TILE_B)
        gi = gi_scr[pl.ds(row, TILE_B), :]                  # (TILE_B, 3*H_P)

        # Single fused hidden-gate matmul per step (bf16 operands, f32 acc).
        gh = jnp.dot(h.astype(whh.dtype), whh,
                     preferred_element_type=jnp.float32)

        r = jax.nn.sigmoid(gi[:, 0:H_P] + gh[:, 0:H_P])
        z = jax.nn.sigmoid(gi[:, H_P:2 * H_P] + gh[:, H_P:2 * H_P])
        n = jnp.tanh(gi[:, 2 * H_P:3 * H_P]
                     + r * (gh[:, 2 * H_P:3 * H_P] + b_hn))
        h_new = n + z * (h - n)                             # == (1-z)*n + z*h
        return h_new, acc + h_new                           # torch.sum(x, 1)

    # Full unroll for short sequences (LLO visibility); cap for long ones.
    unroll = True if T <= 16 else 8
    _, acc = lax.fori_loop(0, T, step, (h0, acc0), unroll=unroll)

    # --- Epilogue: tanh -> fc -> log_softmax --------------------------------
    s = jnp.tanh(acc)
    logits = jnp.dot(s.astype(wfc_ref.dtype), wfc_ref[...],
                     preferred_element_type=jnp.float32) + bfc_ref[...]
    m = jnp.max(logits, axis=-1, keepdims=True)
    shifted = logits - m
    lse = jnp.log(jnp.sum(jnp.exp(shifted), axis=-1, keepdims=True))
    out_ref[...] = (shifted - lse).astype(out_ref.dtype)


def _vmem_limit_bytes(T, TILE_B, E, H_P, C_P):
    """VMEM budget from real (lane-padded) shapes, with double-buffer factor."""
    e_pad = _round_up(E, 128)                         # E<128 lanes pad to 128
    emb_blk = T * TILE_B * e_pad * 2                  # bf16 emb block
    gi = T * TILE_B * 3 * H_P * 4                     # f32 scratch
    w = (e_pad * 3 * H_P + H_P * 3 * H_P + H_P * C_P) * 2
    b = 8 * (3 * H_P + H_P + C_P) * 4                 # sublane-padded biases
    out_blk = TILE_B * C_P * 4
    total = 2 * (emb_blk + w + b + out_blk) + gi      # 2x pipeline buffers
    return int(min(max(total + (4 << 20), 16 << 20), 48 << 20))


def simple_lstm_forward(tokens, params):
    """tokens: (bs, hist_len+1, sent_len) int32 -> (bs, class_size) f32."""
    bs = tokens.shape[0]
    flat = tokens.reshape(bs, -1)                     # (bs, T) int32
    T = flat.shape[1]

    H_P = params["w_hh"].shape[0]
    C_P = params["w_fc"].shape[1]
    C = params["class_size"]
    E = params["emb_w"].shape[1]

    bs8 = _round_up(max(bs, 8), 8)                    # pad batch to sublanes
    TILE_B = min(bs8, 256)                            # MXU-M-sized batch tile
    BS_P = _round_up(bs8, TILE_B)
    n_tiles = BS_P // TILE_B

    # Rearrange the tiny token matrix (not the embedding slab) so the gather
    # lands directly in the kernel's (n_tiles, T, TILE_B) time-major layout.
    tok = flat
    if BS_P != bs:
        tok = jnp.pad(tok, ((0, BS_P - bs), (0, 0)))
    tok = tok.reshape(n_tiles, TILE_B, T).transpose(0, 2, 1)   # (n, T, TILE_B)

    # Embedding lookup (gather stays in plain JAX / XLA); adjacent-dim reshape
    # of a contiguous array is copy-free.
    emb = jnp.take(params["emb_w"], tok, axis=0)      # (n, T, TILE_B, E) bf16
    emb = emb.reshape(n_tiles, T * TILE_B, E)

    flops = (2 * T * BS_P * E * 3 * H_P
             + 2 * T * BS_P * H_P * 3 * H_P
             + 2 * BS_P * H_P * C_P)
    transc = 3 * T * BS_P * H_P + BS_P * H_P + 2 * BS_P * C_P
    bytes_acc = (n_tiles * T * TILE_B * E * 2
                 + (E * 3 * H_P + H_P * 3 * H_P + H_P * C_P) * 2
                 + (3 * H_P + H_P + C_P) * 4
                 + BS_P * C_P * 4)

    out = pl.pallas_call(
        gru_head_kernel,
        out_shape=jax.ShapeDtypeStruct((BS_P, C_P), jnp.float32),
        grid=(n_tiles,),
        in_specs=[
            pl.BlockSpec((1, T * TILE_B, E), lambda b: (b, 0, 0)),
            pl.BlockSpec((E, 3 * H_P), lambda b: (0, 0)),
            pl.BlockSpec((H_P, 3 * H_P), lambda b: (0, 0)),
            pl.BlockSpec((1, 3 * H_P), lambda b: (0, 0)),
            pl.BlockSpec((1, H_P), lambda b: (0, 0)),
            pl.BlockSpec((H_P, C_P), lambda b: (0, 0)),
            pl.BlockSpec((1, C_P), lambda b: (0, 0)),
        ],
        out_specs=pl.BlockSpec((TILE_B, C_P), lambda b: (b, 0)),
        scratch_shapes=[
            pltpu.VMEM((T * TILE_B, 3 * H_P), jnp.float32),  # gi for all steps
        ],
        compiler_params=pltpu.CompilerParams(
            dimension_semantics=("parallel",),
            vmem_limit_bytes=_vmem_limit_bytes(T, TILE_B, E, H_P, C_P)),
        cost_estimate=pl.CostEstimate(
            flops=int(flops), transcendentals=int(transc),
            bytes_accessed=int(bytes_acc)),
    )(emb, params["w_ih"], params["w_hh"], params["b_ih"],
      params["b_hn"], params["w_fc"], params["b_fc"])
    return out[:bs, :C]


def init_params(key, vocab_size, embd_size, hidden_size, class_size,
                *, param_dtype=jnp.bfloat16):
    """Weights packed gate-major (r, z, n) along lanes, padded to (8,128) tiles.

    b_ih carries the folded r/z hidden biases (b_hr, b_hz); only the n-gate
    hidden bias b_hn is kept separate (it must sit inside the r*(.) term).
    """
    H_P = _round_up(hidden_size, 128)
    C_P = _round_up(class_size, 128)
    ks = jax.random.split(key, 7)
    scale = 1.0 / np.sqrt(hidden_size)

    def pad_to(a, shape):
        return jnp.pad(a, [(0, s - d) for d, s in zip(a.shape, shape)])

    # Gate order (r, z, n), matching torch.nn.GRU weight_ih_l0 / weight_hh_l0
    # row blocks; stored transposed (in, out) for x @ W.
    w_ih_g = jax.random.uniform(ks[1], (3, embd_size, hidden_size),
                                jnp.float32, -scale, scale)
    w_hh_g = jax.random.uniform(ks[2], (3, hidden_size, hidden_size),
                                jnp.float32, -scale, scale)
    b_ih_g = jax.random.uniform(ks[3], (3, 1, hidden_size),
                                jnp.float32, -scale, scale)
    b_hh_g = jax.random.uniform(ks[4], (3, 1, hidden_size),
                                jnp.float32, -scale, scale)
    w_fc = jax.random.uniform(ks[5], (hidden_size, class_size),
                              jnp.float32, -scale, scale)
    b_fc = jax.random.uniform(ks[6], (1, class_size),
                              jnp.float32, -scale, scale)

    w_ih = jnp.concatenate(
        [pad_to(w_ih_g[g], (embd_size, H_P)) for g in range(3)], axis=1)
    w_hh = jnp.concatenate(
        [pad_to(w_hh_g[g], (H_P, H_P)) for g in range(3)], axis=1)

    # Fold b_hr, b_hz into the input-side biases (they commute through the
    # sigmoid args); keep b_hn separate for the n-gate r*(...) term.
    b_comb = [b_ih_g[0] + b_hh_g[0], b_ih_g[1] + b_hh_g[1], b_ih_g[2]]
    b_ih = jnp.concatenate([pad_to(b, (1, H_P)) for b in b_comb], axis=1)
    b_hn = pad_to(b_hh_g[2], (1, H_P))

    w_fc_p = pad_to(w_fc, (H_P, C_P))
    # Padded class lanes get -1e9 bias so log_softmax ignores them.
    b_fc_p = jnp.concatenate(
        [b_fc, jnp.full((1, C_P - class_size), -1e9, jnp.float32)], axis=1)

    return {
        "emb_w": jax.random.normal(ks[0], (vocab_size, embd_size),
                                   jnp.float32).astype(param_dtype),
        "w_ih": w_ih.astype(param_dtype),
        "w_hh": w_hh.astype(param_dtype),
        "b_ih": b_ih,                       # biases stay f32 (post-matmul adds)
        "b_hn": b_hn,
        "w_fc": w_fc_p.astype(param_dtype),
        "b_fc": b_fc_p,
        "hidden_size": hidden_size,
        "class_size": class_size,
    }


def reference_forward(tokens, params):
    """Pure-JAX f32 reference mirroring the PyTorch module semantics."""
    bs = tokens.shape[0]
    flat = tokens.reshape(bs, -1)
    H = params["hidden_size"]
    C = params["class_size"]
    H_P = params["w_hh"].shape[0]

    emb_w = params["emb_w"].astype(jnp.float32)
    w_ih = [params["w_ih"][:, g * H_P:g * H_P + H].astype(jnp.float32)
            for g in range(3)]
    w_hh = [params["w_hh"][:H, g * H_P:g * H_P + H].astype(jnp.float32)
            for g in range(3)]
    b_c = [params["b_ih"][:, g * H_P:g * H_P + H] for g in range(3)]
    b_hn = params["b_hn"][:, :H]
    w_fc = params["w_fc"][:H, :C].astype(jnp.float32)
    b_fc = params["b_fc"][:, :C]

    emb = jnp.take(emb_w, flat, axis=0)        # (bs, T, E)

    def step(h, x_t):
        r = jax.nn.sigmoid(x_t @ w_ih[0] + b_c[0] + h @ w_hh[0])
        z = jax.nn.sigmoid(x_t @ w_ih[1] + b_c[1] + h @ w_hh[1])
        n = jnp.tanh(x_t @ w_ih[2] + b_c[2] + r * (h @ w_hh[2] + b_hn))
        h_new = (1.0 - z) * n + z * h          # torch.nn.GRU update
        return h_new, h_new

    h0 = jnp.zeros((bs, H), jnp.float32)
    _, hs = lax.scan(step, h0, jnp.transpose(emb, (1, 0, 2)))
    s = jnp.tanh(jnp.sum(hs, axis=0))
    logits = s @ w_fc + b_fc
    return jax.nn.log_softmax(logits, axis=-1)


if __name__ == "__main__":
    vocab_size, embd_size, hidden_size, class_size = 50, 32, 32, 8
    bs, hist_plus_1, sent_len = 2, 2, 4        # T = 8

    key = jax.random.PRNGKey(0)
    k_tok, k_par = jax.random.split(key)
    tokens = jax.random.randint(k_tok, (bs, hist_plus_1, sent_len), 0,
                                vocab_size, dtype=jnp.int32)
    params = init_params(k_par, vocab_size, embd_size, hidden_size, class_size)

    out = jax.block_until_ready(simple_lstm_forward(tokens, params))
    ref = jax.block_until_ready(reference_forward(tokens, params))

    assert out.shape == (bs, class_size)
    # bf16 operands / hidden-state rounding vs full-f32 reference.
    np.testing.assert_allclose(np.asarray(out), np.asarray(ref),
                               rtol=2e-2, atol=5e-2)

    print("KERNEL_OK")
</pallas_src>

<mosaic_0001>
module attributes {stable_mosaic.version = 11 : i64} {
  func.func @gru_head_kernel(%arg0: i32, %arg1: memref<1x64x32xbf16, #tpu.memory_space<vmem>>, %arg2: memref<32x384xbf16, #tpu.memory_space<vmem>>, %arg3: memref<128x384xbf16, #tpu.memory_space<vmem>>, %arg4: memref<1x384xf32, #tpu.memory_space<vmem>>, %arg5: memref<1x128xf32, #tpu.memory_space<vmem>>, %arg6: memref<128x128xbf16, #tpu.memory_space<vmem>>, %arg7: memref<1x128xf32, #tpu.memory_space<vmem>>, %arg8: memref<8x128xf32, #tpu.memory_space<vmem>>, %arg9: memref<64x384xf32, #tpu.memory_space<vmem>>) attributes {dimension_semantics = [#tpu.dimension_semantics<parallel>], iteration_bounds = array<i64: 1>, scalar_prefetch = 0 : i64, scratch_operands = 1 : i64, tpu.core_type = #tpu.core_type<tc>, window_params = [{transform_indices = @transform_0, window_bounds = array<i64: 1, 64, 32>}, {pipeline_mode = #tpu.pipeline_mode<synchronous>, transform_indices = @transform_1, window_bounds = array<i64: 32, 384>}, {pipeline_mode = #tpu.pipeline_mode<synchronous>, transform_indices = @transform_2, window_bounds = array<i64: 128, 384>}, {pipeline_mode = #tpu.pipeline_mode<synchronous>, transform_indices = @transform_3, window_bounds = array<i64: 1, 384>}, {pipeline_mode = #tpu.pipeline_mode<synchronous>, transform_indices = @transform_4, window_bounds = array<i64: 1, 128>}, {pipeline_mode = #tpu.pipeline_mode<synchronous>, transform_indices = @transform_5, window_bounds = array<i64: 128, 128>}, {pipeline_mode = #tpu.pipeline_mode<synchronous>, transform_indices = @transform_6, window_bounds = array<i64: 1, 128>}, {transform_indices = @transform_7, window_bounds = array<i64: 8, 128>}]} {
    %c0 = arith.constant 0 : index
    %c0_0 = arith.constant 0 : index
    %c0_1 = arith.constant 0 : index
    %0 = vector.load %arg1[%c0, %c0_0, %c0_1] : memref<1x64x32xbf16, #tpu.memory_space<vmem>>, vector<1x64x32xbf16>
    %1 = vector.shape_cast %0 : vector<1x64x32xbf16> to vector<64x32xbf16>
    %c0_2 = arith.constant 0 : index
    %c0_3 = arith.constant 0 : index
    %2 = vector.load %arg2[%c0_2, %c0_3] : memref<32x384xbf16, #tpu.memory_space<vmem>>, vector<32x384xbf16>
    %cst = arith.constant dense<0.000000e+00> : vector<64x384xf32>
    %3 = tpu.matmul %1, %2, %cst {dimension_numbers = #tpu.dot_dimension_numbers<[1], [0], [0], [1], [0, 0, 1, 1], [], []>} : vector<64x32xbf16>, vector<32x384xbf16>, vector<64x384xf32> -> vector<64x384xf32>
    %c0_4 = arith.constant 0 : index
    %c0_5 = arith.constant 0 : index
    %4 = vector.load %arg4[%c0_4, %c0_5] : memref<1x384xf32, #tpu.memory_space<vmem>>, vector<1x384xf32>
    %5 = vector.broadcast %4 : vector<1x384xf32> to vector<64x384xf32>
    %6 = arith.addf %3, %5 : vector<64x384xf32>
    %c0_6 = arith.constant 0 : index
    %c0_7 = arith.constant 0 : index
    %7 = vector.load %arg9[%c0_6, %c0_7] : memref<64x384xf32, #tpu.memory_space<vmem>>, vector<64x384xf32>
    tpu.vector_store %arg9[%c0_6, %c0_7], %6 {strides = array<i32>} : memref<64x384xf32, #tpu.memory_space<vmem>>, vector<64x384xf32>,
    %c0_8 = arith.constant 0 : index
    %c0_9 = arith.constant 0 : index
    %8 = vector.load %arg3[%c0_8, %c0_9] : memref<128x384xbf16, #tpu.memory_space<vmem>>, vector<128x384xbf16>
    %c0_10 = arith.constant 0 : index
    %c0_11 = arith.constant 0 : index
    %9 = vector.load %arg5[%c0_10, %c0_11] : memref<1x128xf32, #tpu.memory_space<vmem>>, vector<1x128xf32>
    %10 = vector.shape_cast %9 : vector<1x128xf32> to vector<1x128xf32>
    %11 = vector.broadcast %10 : vector<1x128xf32> to vector<8x128xf32>
    %cst_12 = arith.constant 0.000000e+00 : f32
    %12 = vector.broadcast %cst_12 : f32 to vector<8x128xf32>
    %cst_13 = arith.constant 0.000000e+00 : f32
    %13 = vector.broadcast %cst_13 : f32 to vector<8x128xf32>
    %c0_i32 = arith.constant 0 : i32
    %c8_i32 = arith.constant 8 : i32
    %14 = arith.muli %c0_i32, %c8_i32 : i32
    %15 = tpu.assume_multiple %14, 8 : i32
    %16 = arith.index_cast %15 : i32 to index
    %c0_14 = arith.constant 0 : index
    %17 = vector.load %arg9[%16, %c0_14] : memref<64x384xf32, #tpu.memory_space<vmem>>, vector<8x384xf32>
    %18 = arith.truncf %12 : vector<8x128xf32> to vector<8x128xbf16>
    %cst_15 = arith.constant dense<0.000000e+00> : vector<8x384xf32>
    %19 = tpu.matmul %18, %8, %cst_15 {dimension_numbers = #tpu.dot_dimension_numbers<[1], [0], [0], [1], [0, 0, 1, 1], [], []>} : vector<8x128xbf16>, vector<128x384xbf16>, vector<8x384xf32> -> vector<8x384xf32>
    %20 = vector.extract_strided_slice %17 {offsets = [0, 0], sizes = [8, 128], strides = [1, 1]} : vector<8x384xf32> to vector<8x128xf32>
    %21 = vector.extract_strided_slice %19 {offsets = [0, 0], sizes = [8, 128], strides = [1, 1]} : vector<8x384xf32> to vector<8x128xf32>
    %22 = arith.addf %20, %21 : vector<8x128xf32>
    %23 = arith.negf %22 : vector<8x128xf32>
    %24 = math.exp %23 : vector<8x128xf32>
    %cst_16 = arith.constant 1.000000e+00 : f32
    %25 = vector.broadcast %cst_16 : f32 to vector<8x128xf32>
    %26 = arith.addf %25, %24 : vector<8x128xf32>
    %27 = arith.divf %25, %26 : vector<8x128xf32>
    %28 = vector.extract_strided_slice %17 {offsets = [0, 128], sizes = [8, 128], strides = [1, 1]} : vector<8x384xf32> to vector<8x128xf32>
    %29 = vector.extract_strided_slice %19 {offsets = [0, 128], sizes = [8, 128], strides = [1, 1]} : vector<8x384xf32> to vector<8x128xf32>
    %30 = arith.addf %28, %29 : vector<8x128xf32>
    %31 = arith.negf %30 : vector<8x128xf32>
    %32 = math.exp %31 : vector<8x128xf32>
    %cst_17 = arith.constant 1.000000e+00 : f32
    %33 = vector.broadcast %cst_17 : f32 to vector<8x128xf32>
    %34 = arith.addf %33, %32 : vector<8x128xf32>
    %35 = arith.divf %33, %34 : vector<8x128xf32>
    %36 = vector.extract_strided_slice %17 {offsets = [0, 256], sizes = [8, 128], strides = [1, 1]} : vector<8x384xf32> to vector<8x128xf32>
    %37 = vector.extract_strided_slice %19 {offsets = [0, 256], sizes = [8, 128], strides = [1, 1]} : vector<8x384xf32> to vector<8x128xf32>
    %38 = arith.addf %37, %11 : vector<8x128xf32>
    %39 = arith.mulf %27, %38 : vector<8x128xf32>
    %40 = arith.addf %36, %39 : vector<8x128xf32>
    %41 = math.tanh %40 : vector<8x128xf32>
    %42 = arith.subf %12, %41 : vector<8x128xf32>
    %43 = arith.mulf %35, %42 : vector<8x128xf32>
    %44 = arith.addf %41, %43 : vector<8x128xf32>
    %45 = arith.addf %13, %44 : vector<8x128xf32>
    %c1_i32 = arith.constant 1 : i32
    %c8_i32_18 = arith.constant 8 : i32
    %46 = arith.muli %c1_i32, %c8_i32_18 : i32
    %47 = tpu.assume_multiple %46, 8 : i32
    %48 = arith.index_cast %47 : i32 to index
    %c0_19 = arith.constant 0 : index
    %49 = vector.load %arg9[%48, %c0_19] : memref<64x384xf32, #tpu.memory_space<vmem>>, vector<8x384xf32>
    %50 = arith.truncf %44 : vector<8x128xf32> to vector<8x128xbf16>
    %cst_20 = arith.constant dense<0.000000e+00> : vector<8x384xf32>
    %51 = tpu.matmul %50, %8, %cst_20 {dimension_numbers = #tpu.dot_dimension_numbers<[1], [0], [0], [1], [0, 0, 1, 1], [], []>} : vector<8x128xbf16>, vector<128x384xbf16>, vector<8x384xf32> -> vector<8x384xf32>
    %52 = vector.extract_strided_slice %49 {offsets = [0, 0], sizes = [8, 128], strides = [1, 1]} : vector<8x384xf32> to vector<8x128xf32>
    %53 = vector.extract_strided_slice %51 {offsets = [0, 0], sizes = [8, 128], strides = [1, 1]} : vector<8x384xf32> to vector<8x128xf32>
    %54 = arith.addf %52, %53 : vector<8x128xf32>
    %55 = arith.negf %54 : vector<8x128xf32>
    %56 = math.exp %55 : vector<8x128xf32>
    %cst_21 = arith.constant 1.000000e+00 : f32
    %57 = vector.broadcast %cst_21 : f32 to vector<8x128xf32>
    %58 = arith.addf %57, %56 : vector<8x128xf32>
    %59 = arith.divf %57, %58 : vector<8x128xf32>
    %60 = vector.extract_strided_slice %49 {offsets = [0, 128], sizes = [8, 128], strides = [1, 1]} : vector<8x384xf32> to vector<8x128xf32>
    %61 = vector.extract_strided_slice %51 {offsets = [0, 128], sizes = [8, 128], strides = [1, 1]} : vector<8x384xf32> to vector<8x128xf32>
    %62 = arith.addf %60, %61 : vector<8x128xf32>
    %63 = arith.negf %62 : vector<8x128xf32>
    %64 = math.exp %63 : vector<8x128xf32>
    %cst_22 = arith.constant 1.000000e+00 : f32
    %65 = vector.broadcast %cst_22 : f32 to vector<8x128xf32>
    %66 = arith.addf %65, %64 : vector<8x128xf32>
    %67 = arith.divf %65, %66 : vector<8x128xf32>
    %68 = vector.extract_strided_slice %49 {offsets = [0, 256], sizes = [8, 128], strides = [1, 1]} : vector<8x384xf32> to vector<8x128xf32>
    %69 = vector.extract_strided_slice %51 {offsets = [0, 256], sizes = [8, 128], strides = [1, 1]} : vector<8x384xf32> to vector<8x128xf32>
    %70 = arith.addf %69, %11 : vector<8x128xf32>
    %71 = arith.mulf %59, %70 : vector<8x128xf32>
    %72 = arith.addf %68, %71 : vector<8x128xf32>
    %73 = math.tanh %72 : vector<8x128xf32>
    %74 = arith.subf %44, %73 : vector<8x128xf32>
    %75 = arith.mulf %67, %74 : vector<8x128xf32>
    %76 = arith.addf %73, %75 : vector<8x128xf32>
    %77 = arith.addf %45, %76 : vector<8x128xf32>
    %c2_i32 = arith.constant 2 : i32
    %c8_i32_23 = arith.constant 8 : i32
    %78 = arith.muli %c2_i32, %c8_i32_23 : i32
    %79 = tpu.assume_multiple %78, 8 : i32
    %80 = arith.index_cast %79 : i32 to index
    %c0_24 = arith.constant 0 : index
    %81 = vector.load %arg9[%80, %c0_24] : memref<64x384xf32, #tpu.memory_space<vmem>>, vector<8x384xf32>
    %82 = arith.truncf %76 : vector<8x128xf32> to vector<8x128xbf16>
    %cst_25 = arith.constant dense<0.000000e+00> : vector<8x384xf32>
    %83 = tpu.matmul %82, %8, %cst_25 {dimension_numbers = #tpu.dot_dimension_numbers<[1], [0], [0], [1], [0, 0, 1, 1], [], []>} : vector<8x128xbf16>, vector<128x384xbf16>, vector<8x384xf32> -> vector<8x384xf32>
    %84 = vector.extract_strided_slice %81 {offsets = [0, 0], sizes = [8, 128], strides = [1, 1]} : vector<8x384xf32> to vector<8x128xf32>
    %85 = vector.extract_strided_slice %83 {offsets = [0, 0], sizes = [8, 128], strides = [1, 1]} : vector<8x384xf32> to vector<8x128xf32>
    %86 = arith.addf %84, %85 : vector<8x128xf32>
    %87 = arith.negf %86 : vector<8x128xf32>
    %88 = math.exp %87 : vector<8x128xf32>
    %cst_26 = arith.constant 1.000000e+00 : f32
    %89 = vector.broadcast %cst_26 : f32 to vector<8x128xf32>
    %90 = arith.addf %89, %88 : vector<8x128xf32>
    %91 = arith.divf %89, %90 : vector<8x128xf32>
    %92 = vector.extract_strided_slice %81 {offsets = [0, 128], sizes = [8, 128], strides = [1, 1]} : vector<8x384xf32> to vector<8x128xf32>
    %93 = vector.extract_strided_slice %83 {offsets = [0, 128], sizes = [8, 128], strides = [1, 1]} : vector<8x384xf32> to vector<8x128xf32>
    %94 = arith.addf %92, %93 : vector<8x128xf32>
    %95 = arith.negf %94 : vector<8x128xf32>
    %96 = math.exp %95 : vector<8x128xf32>
    %cst_27 = arith.constant 1.000000e+00 : f32
    %97 = vector.broadcast %cst_27 : f32 to vector<8x128xf32>
    %98 = arith.addf %97, %96 : vector<8x128xf32>
    %99 = arith.divf %97, %98 : vector<8x128xf32>
    %100 = vector.extract_strided_slice %81 {offsets = [0, 256], sizes = [8, 128], strides = [1, 1]} : vector<8x384xf32> to vector<8x128xf32>
    %101 = vector.extract_strided_slice %83 {offsets = [0, 256], sizes = [8, 128], strides = [1, 1]} : vector<8x384xf32> to vector<8x128xf32>
    %102 = arith.addf %101, %11 : vector<8x128xf32>
    %103 = arith.mulf %91, %102 : vector<8x128xf32>
    %104 = arith.addf %100, %103 : vector<8x128xf32>
    %105 = math.tanh %104 : vector<8x128xf32>
    %106 = arith.subf %76, %105 : vector<8x128xf32>
    %107 = arith.mulf %99, %106 : vector<8x128xf32>
    %108 = arith.addf %105, %107 : vector<8x128xf32>
    %109 = arith.addf %77, %108 : vector<8x128xf32>
    %c3_i32 = arith.constant 3 : i32
    %c8_i32_28 = arith.constant 8 : i32
    %110 = arith.muli %c3_i32, %c8_i32_28 : i32
    %111 = tpu.assume_multiple %110, 8 : i32
    %112 = arith.index_cast %111 : i32 to index
    %c0_29 = arith.constant 0 : index
    %113 = vector.load %arg9[%112, %c0_29] : memref<64x384xf32, #tpu.memory_space<vmem>>, vector<8x384xf32>
    %114 = arith.truncf %108 : vector<8x128xf32> to vector<8x128xbf16>
    %cst_30 = arith.constant dense<0.000000e+00> : vector<8x384xf32>
    %115 = tpu.matmul %114, %8, %cst_30 {dimension_numbers = #tpu.dot_dimension_numbers<[1], [0], [0], [1], [0, 0, 1, 1], [], []>} : vector<8x128xbf16>, vector<128x384xbf16>, vector<8x384xf32> -> vector<8x384xf32>
    %116 = vector.extract_strided_slice %113 {offsets = [0, 0], sizes = [8, 128], strides = [1, 1]} : vector<8x384xf32> to vector<8x128xf32>
    %117 = vector.extract_strided_slice %115 {offsets = [0, 0], sizes = [8, 128], strides = [1, 1]} : vector<8x384xf32> to vector<8x128xf32>
    %118 = arith.addf %116, %117 : vector<8x128xf32>
    %119 = arith.negf %118 : vector<8x128xf32>
    %120 = math.exp %119 : vector<8x128xf32>
    %cst_31 = arith.constant 1.000000e+00 : f32
    %121 = vector.broadcast %cst_31 : f32 to vector<8x128xf32>
    %122 = arith.addf %121, %120 : vector<8x128xf32>
    %123 = arith.divf %121, %122 : vector<8x128xf32>
    %124 = vector.extract_strided_slice %113 {offsets = [0, 128], sizes = [8, 128], strides = [1, 1]} : vector<8x384xf32> to vector<8x128xf32>
    %125 = vector.extract_strided_slice %115 {offsets = [0, 128], sizes = [8, 128], strides = [1, 1]} : vector<8x384xf32> to vector<8x128xf32>
    %126 = arith.addf %124, %125 : vector<8x128xf32>
    %127 = arith.negf %126 : vector<8x128xf32>
    %128 = math.exp %127 : vector<8x128xf32>
    %cst_32 = arith.constant 1.000000e+00 : f32
    %129 = vector.broadcast %cst_32 : f32 to vector<8x128xf32>
    %130 = arith.addf %129, %128 : vector<8x128xf32>
    %131 = arith.divf %129, %130 : vector<8x128xf32>
    %132 = vector.extract_strided_slice %113 {offsets = [0, 256], sizes = [8, 128], strides = [1, 1]} : vector<8x384xf32> to vector<8x128xf32>
    %133 = vector.extract_strided_slice %115 {offsets = [0, 256], sizes = [8, 128], strides = [1, 1]} : vector<8x384xf32> to vector<8x128xf32>
    %134 = arith.addf %133, %11 : vector<8x128xf32>
    %135 = arith.mulf %123, %134 : vector<8x128xf32>
    %136 = arith.addf %132, %135 : vector<8x128xf32>
    %137 = math.tanh %136 : vector<8x128xf32>
    %138 = arith.subf %108, %137 : vector<8x128xf32>
    %139 = arith.mulf %131, %138 : vector<8x128xf32>
    %140 = arith.addf %137, %139 : vector<8x128xf32>
    %141 = arith.addf %109, %140 : vector<8x128xf32>
    %c4_i32 = arith.constant 4 : i32
    %c8_i32_33 = arith.constant 8 : i32
    %142 = arith.muli %c4_i32, %c8_i32_33 : i32
    %143 = tpu.assume_multiple %142, 8 : i32
    %144 = arith.index_cast %143 : i32 to index
    %c0_34 = arith.constant 0 : index
    %145 = vector.load %arg9[%144, %c0_34] : memref<64x384xf32, #tpu.memory_space<vmem>>, vector<8x384xf32>
    %146 = arith.truncf %140 : vector<8x128xf32> to vector<8x128xbf16>
    %cst_35 = arith.constant dense<0.000000e+00> : vector<8x384xf32>
    %147 = tpu.matmul %146, %8, %cst_35 {dimension_numbers = #tpu.dot_dimension_numbers<[1], [0], [0], [1], [0, 0, 1, 1], [], []>} : vector<8x128xbf16>, vector<128x384xbf16>, vector<8x384xf32> -> vector<8x384xf32>
    %148 = vector.extract_strided_slice %145 {offsets = [0, 0], sizes = [8, 128], strides = [1, 1]} : vector<8x384xf32> to vector<8x128xf32>
    %149 = vector.extract_strided_slice %147 {offsets = [0, 0], sizes = [8, 128], strides = [1, 1]} : vector<8x384xf32> to vector<8x128xf32>
    %150 = arith.addf %148, %149 : vector<8x128xf32>
    %151 = arith.negf %150 : vector<8x128xf32>
    %152 = math.exp %151 : vector<8x128xf32>
    %cst_36 = arith.constant 1.000000e+00 : f32
    %153 = vector.broadcast %cst_36 : f32 to vector<8x128xf32>
    %154 = arith.addf %153, %152 : vector<8x128xf32>
    %155 = arith.divf %153, %154 : vector<8x128xf32>
    %156 = vector.extract_strided_slice %145 {offsets = [0, 128], sizes = [8, 128], strides = [1, 1]} : vector<8x384xf32> to vector<8x128xf32>
    %157 = vector.extract_strided_slice %147 {offsets = [0, 128], sizes = [8, 128], strides = [1, 1]} : vector<8x384xf32> to vector<8x128xf32>
    %158 = arith.addf %156, %157 : vector<8x128xf32>
    %159 = arith.negf %158 : vector<8x128xf32>
    %160 = math.exp %159 : vector<8x128xf32>
    %cst_37 = arith.constant 1.000000e+00 : f32
    %161 = vector.broadcast %cst_37 : f32 to vector<8x128xf32>
    %162 = arith.addf %161, %160 : vector<8x128xf32>
    %163 = arith.divf %161, %162 : vector<8x128xf32>
    %164 = vector.extract_strided_slice %145 {offsets = [0, 256], sizes = [8, 128], strides = [1, 1]} : vector<8x384xf32> to vector<8x128xf32>
    %165 = vector.extract_strided_slice %147 {offsets = [0, 256], sizes = [8, 128], strides = [1, 1]} : vector<8x384xf32> to vector<8x128xf32>
    %166 = arith.addf %165, %11 : vector<8x128xf32>
    %167 = arith.mulf %155, %166 : vector<8x128xf32>
    %168 = arith.addf %164, %167 : vector<8x128xf32>
    %169 = math.tanh %168 : vector<8x128xf32>
    %170 = arith.subf %140, %169 : vector<8x128xf32>
    %171 = arith.mulf %163, %170 : vector<8x128xf32>
    %172 = arith.addf %169, %171 : vector<8x128xf32>
    %173 = arith.addf %141, %172 : vector<8x128xf32>
    %c5_i32 = arith.constant 5 : i32
    %c8_i32_38 = arith.constant 8 : i32
    %174 = arith.muli %c5_i32, %c8_i32_38 : i32
    %175 = tpu.assume_multiple %174, 8 : i32
    %176 = arith.index_cast %175 : i32 to index
    %c0_39 = arith.constant 0 : index
    %177 = vector.load %arg9[%176, %c0_39] : memref<64x384xf32, #tpu.memory_space<vmem>>, vector<8x384xf32>
    %178 = arith.truncf %172 : vector<8x128xf32> to vector<8x128xbf16>
    %cst_40 = arith.constant dense<0.000000e+00> : vector<8x384xf32>
    %179 = tpu.matmul %178, %8, %cst_40 {dimension_numbers = #tpu.dot_dimension_numbers<[1], [0], [0], [1], [0, 0, 1, 1], [], []>} : vector<8x128xbf16>, vector<128x384xbf16>, vector<8x384xf32> -> vector<8x384xf32>
    %180 = vector.extract_strided_slice %177 {offsets = [0, 0], sizes = [8, 128], strides = [1, 1]} : vector<8x384xf32> to vector<8x128xf32>
    %181 = vector.extract_strided_slice %179 {offsets = [0, 0], sizes = [8, 128], strides = [1, 1]} : vector<8x384xf32> to vector<8x128xf32>
    %182 = arith.addf %180, %181 : vector<8x128xf32>
    %183 = arith.negf %182 : vector<8x128xf32>
    %184 = math.exp %183 : vector<8x128xf32>
    %cst_41 = arith.constant 1.000000e+00 : f32
    %185 = vector.broadcast %cst_41 : f32 to vector<8x128xf32>
    %186 = arith.addf %185, %184 : vector<8x128xf32>
    %187 = arith.divf %185, %186 : vector<8x128xf32>
    %188 = vector.extract_strided_slice %177 {offsets = [0, 128], sizes = [8, 128], strides = [1, 1]} : vector<8x384xf32> to vector<8x128xf32>
    %189 = vector.extract_strided_slice %179 {offsets = [0, 128], sizes = [8, 128], strides = [1, 1]} : vector<8x384xf32> to vector<8x128xf32>
    %190 = arith.addf %188, %189 : vector<8x128xf32>
    %191 = arith.negf %190 : vector<8x128xf32>
    %192 = math.exp %191 : vector<8x128xf32>
    %cst_42 = arith.constant 1.000000e+00 : f32
    %193 = vector.broadcast %cst_42 : f32 to vector<8x128xf32>
    %194 = arith.addf %193, %192 : vector<8x128xf32>
    %195 = arith.divf %193, %194 : vector<8x128xf32>
    %196 = vector.extract_strided_slice %177 {offsets = [0, 256], sizes = [8, 128], strides = [1, 1]} : vector<8x384xf32> to vector<8x128xf32>
    %197 = vector.extract_strided_slice %179 {offsets = [0, 256], sizes = [8, 128], strides = [1, 1]} : vector<8x384xf32> to vector<8x128xf32>
    %198 = arith.addf %197, %11 : vector<8x128xf32>
    %199 = arith.mulf %187, %198 : vector<8x128xf32>
    %200 = arith.addf %196, %199 : vector<8x128xf32>
    %201 = math.tanh %200 : vector<8x128xf32>
    %202 = arith.subf %172, %201 : vector<8x128xf32>
    %203 = arith.mulf %195, %202 : vector<8x128xf32>
    %204 = arith.addf %201, %203 : vector<8x128xf32>
    %205 = arith.addf %173, %204 : vector<8x128xf32>
    %c6_i32 = arith.constant 6 : i32
    %c8_i32_43 = arith.constant 8 : i32
    %206 = arith.muli %c6_i32, %c8_i32_43 : i32
    %207 = tpu.assume_multiple %206, 8 : i32
    %208 = arith.index_cast %207 : i32 to index
    %c0_44 = arith.constant 0 : index
    %209 = vector.load %arg9[%208, %c0_44] : memref<64x384xf32, #tpu.memory_space<vmem>>, vector<8x384xf32>
    %210 = arith.truncf %204 : vector<8x128xf32> to vector<8x128xbf16>
    %cst_45 = arith.constant dense<0.000000e+00> : vector<8x384xf32>
    %211 = tpu.matmul %210, %8, %cst_45 {dimension_numbers = #tpu.dot_dimension_numbers<[1], [0], [0], [1], [0, 0, 1, 1], [], []>} : vector<8x128xbf16>, vector<128x384xbf16>, vector<8x384xf32> -> vector<8x384xf32>
    %212 = vector.extract_strided_slice %209 {offsets = [0, 0], sizes = [8, 128], strides = [1, 1]} : vector<8x384xf32> to vector<8x128xf32>
    %213 = vector.extract_strided_slice %211 {offsets = [0, 0], sizes = [8, 128], strides = [1, 1]} : vector<8x384xf32> to vector<8x128xf32>
    %214 = arith.addf %212, %213 : vector<8x128xf32>
    %215 = arith.negf %214 : vector<8x128xf32>
    %216 = math.exp %215 : vector<8x128xf32>
    %cst_46 = arith.constant 1.000000e+00 : f32
    %217 = vector.broadcast %cst_46 : f32 to vector<8x128xf32>
    %218 = arith.addf %217, %216 : vector<8x128xf32>
    %219 = arith.divf %217, %218 : vector<8x128xf32>
    %220 = vector.extract_strided_slice %209 {offsets = [0, 128], sizes = [8, 128], strides = [1, 1]} : vector<8x384xf32> to vector<8x128xf32>
    %221 = vector.extract_strided_slice %211 {offsets = [0, 128], sizes = [8, 128], strides = [1, 1]} : vector<8x384xf32> to vector<8x128xf32>
    %222 = arith.addf %220, %221 : vector<8x128xf32>
    %223 = arith.negf %222 : vector<8x128xf32>
    %224 = math.exp %223 : vector<8x128xf32>
    %cst_47 = arith.constant 1.000000e+00 : f32
    %225 = vector.broadcast %cst_47 : f32 to vector<8x128xf32>
    %226 = arith.addf %225, %224 : vector<8x128xf32>
    %227 = arith.divf %225, %226 : vector<8x128xf32>
    %228 = vector.extract_strided_slice %209 {offsets = [0, 256], sizes = [8, 128], strides = [1, 1]} : vector<8x384xf32> to vector<8x128xf32>
    %229 = vector.extract_strided_slice %211 {offsets = [0, 256], sizes = [8, 128], strides = [1, 1]} : vector<8x384xf32> to vector<8x128xf32>
    %230 = arith.addf %229, %11 : vector<8x128xf32>
    %231 = arith.mulf %219, %230 : vector<8x128xf32>
    %232 = arith.addf %228, %231 : vector<8x128xf32>
    %233 = math.tanh %232 : vector<8x128xf32>
    %234 = arith.subf %204, %233 : vector<8x128xf32>
    %235 = arith.mulf %227, %234 : vector<8x128xf32>
    %236 = arith.addf %233, %235 : vector<8x128xf32>
    %237 = arith.addf %205, %236 : vector<8x128xf32>
    %c7_i32 = arith.constant 7 : i32
    %c8_i32_48 = arith.constant 8 : i32
    %238 = arith.muli %c7_i32, %c8_i32_48 : i32
    %239 = tpu.assume_multiple %238, 8 : i32
    %240 = arith.index_cast %239 : i32 to index
    %c0_49 = arith.constant 0 : index
    %241 = vector.load %arg9[%240, %c0_49] : memref<64x384xf32, #tpu.memory_space<vmem>>, vector<8x384xf32>
    %242 = arith.truncf %236 : vector<8x128xf32> to vector<8x128xbf16>
    %cst_50 = arith.constant dense<0.000000e+00> : vector<8x384xf32>
    %243 = tpu.matmul %242, %8, %cst_50 {dimension_numbers = #tpu.dot_dimension_numbers<[1], [0], [0], [1], [0, 0, 1, 1], [], []>} : vector<8x128xbf16>, vector<128x384xbf16>, vector<8x384xf32> -> vector<8x384xf32>
    %244 = vector.extract_strided_slice %241 {offsets = [0, 0], sizes = [8, 128], strides = [1, 1]} : vector<8x384xf32> to vector<8x128xf32>
    %245 = vector.extract_strided_slice %243 {offsets = [0, 0], sizes = [8, 128], strides = [1, 1]} : vector<8x384xf32> to vector<8x128xf32>
    %246 = arith.addf %244, %245 : vector<8x128xf32>
    %247 = arith.negf %246 : vector<8x128xf32>
    %248 = math.exp %247 : vector<8x128xf32>
    %cst_51 = arith.constant 1.000000e+00 : f32
    %249 = vector.broadcast %cst_51 : f32 to vector<8x128xf32>
    %250 = arith.addf %249, %248 : vector<8x128xf32>
    %251 = arith.divf %249, %250 : vector<8x128xf32>
    %252 = vector.extract_strided_slice %241 {offsets = [0, 128], sizes = [8, 128], strides = [1, 1]} : vector<8x384xf32> to vector<8x128xf32>
    %253 = vector.extract_strided_slice %243 {offsets = [0, 128], sizes = [8, 128], strides = [1, 1]} : vector<8x384xf32> to vector<8x128xf32>
    %254 = arith.addf %252, %253 : vector<8x128xf32>
    %255 = arith.negf %254 : vector<8x128xf32>
    %256 = math.exp %255 : vector<8x128xf32>
    %cst_52 = arith.constant 1.000000e+00 : f32
    %257 = vector.broadcast %cst_52 : f32 to vector<8x128xf32>
    %258 = arith.addf %257, %256 : vector<8x128xf32>
    %259 = arith.divf %257, %258 : vector<8x128xf32>
    %260 = vector.extract_strided_slice %241 {offsets = [0, 256], sizes = [8, 128], strides = [1, 1]} : vector<8x384xf32> to vector<8x128xf32>
    %261 = vector.extract_strided_slice %243 {offsets = [0, 256], sizes = [8, 128], strides = [1, 1]} : vector<8x384xf32> to vector<8x128xf32>
    %262 = arith.addf %261, %11 : vector<8x128xf32>
    %263 = arith.mulf %251, %262 : vector<8x128xf32>
    %264 = arith.addf %260, %263 : vector<8x128xf32>
    %265 = math.tanh %264 : vector<8x128xf32>
    %266 = arith.subf %236, %265 : vector<8x128xf32>
    %267 = arith.mulf %259, %266 : vector<8x128xf32>
    %268 = arith.addf %265, %267 : vector<8x128xf32>
    %269 = arith.addf %237, %268 : vector<8x128xf32>
    %c8_i32_53 = arith.constant 8 : i32
    %270 = math.tanh %269 : vector<8x128xf32>
    %271 = arith.truncf %270 : vector<8x128xf32> to vector<8x128xbf16>
    %c0_54 = arith.constant 0 : index
    %c0_55 = arith.constant 0 : index
    %272 = vector.load %arg6[%c0_54, %c0_55] : memref<128x128xbf16, #tpu.memory_space<vmem>>, vector<128x128xbf16>
    %cst_56 = arith.constant dense<0.000000e+00> : vector<8x128xf32>
    %273 = tpu.matmul %271, %272, %cst_56 {dimension_numbers = #tpu.dot_dimension_numbers<[1], [0], [0], [1], [0, 0, 1, 1], [], []>} : vector<8x128xbf16>, vector<128x128xbf16>, vector<8x128xf32> -> vector<8x128xf32>
    %c0_57 = arith.constant 0 : index
    %c0_58 = arith.constant 0 : index
    %274 = vector.load %arg7[%c0_57, %c0_58] : memref<1x128xf32, #tpu.memory_space<vmem>>, vector<1x128xf32>
    %275 = vector.broadcast %274 : vector<1x128xf32> to vector<8x128xf32>
    %276 = arith.addf %273, %275 : vector<8x128xf32>
    %cst_59 = arith.constant dense<0xFF800000> : vector<8xf32>
    %277 = vector.multi_reduction <maximumf>, %276, %cst_59 [1] : vector<8x128xf32> to vector<8xf32>
    %278 = vector.shape_cast %277 : vector<8xf32> to vector<8x1xf32>
    %279 = vector.broadcast %278 : vector<8x1xf32> to vector<8x128xf32>
    %280 = arith.subf %276, %279 : vector<8x128xf32>
    %281 = math.exp %280 : vector<8x128xf32>
    %cst_60 = arith.constant dense<0.000000e+00> : vector<8xf32>
    %282 = vector.multi_reduction <add>, %281, %cst_60 [1] : vector<8x128xf32> to vector<8xf32>
    %283 = vector.shape_cast %282 : vector<8xf32> to vector<8x1xf32>
    %284 = math.log %283 : vector<8x1xf32>
    %285 = vector.broadcast %284 : vector<8x1xf32> to vector<8x128xf32>
    %286 = arith.subf %280, %285 : vector<8x128xf32>
    %c0_61 = arith.constant 0 : index
    %c0_62 = arith.constant 0 : index
    %287 = vector.load %arg8[%c0_61, %c0_62] : memref<8x128xf32, #tpu.memory_space<vmem>>, vector<8x128xf32>
    tpu.vector_store %arg8[%c0_61, %c0_62], %286 {strides = array<i32>} : memref<8x128xf32, #tpu.memory_space<vmem>>, vector<8x128xf32>,
    return
  }
  func.func @transform_0(%arg0: i32) -> (i32, i32, i32) {
    %c0_i32 = arith.constant 0 : i32
    %c0_i32_0 = arith.constant 0 : i32
    %c0_i32_1 = arith.constant 0 : i32
    return %arg0, %c0_i32, %c0_i32_0 : i32, i32, i32
  }
  func.func @transform_1(%arg0: i32) -> (i32, i32) {
    %c0_i32 = arith.constant 0 : i32
    %c0_i32_0 = arith.constant 0 : i32
    %c0_i32_1 = arith.constant 0 : i32
    return %c0_i32, %c0_i32_0 : i32, i32
  }
  func.func @transform_2(%arg0: i32) -> (i32, i32) {
    %c0_i32 = arith.constant 0 : i32
    %c0_i32_0 = arith.constant 0 : i32
    %c0_i32_1 = arith.constant 0 : i32
    return %c0_i32, %c0_i32_0 : i32, i32
  }
  func.func @transform_3(%arg0: i32) -> (i32, i32) {
    %c0_i32 = arith.constant 0 : i32
    %c0_i32_0 = arith.constant 0 : i32
    %c0_i32_1 = arith.constant 0 : i32
    return %c0_i32, %c0_i32_0 : i32, i32
  }
  func.func @transform_4(%arg0: i32) -> (i32, i32) {
    %c0_i32 = arith.constant 0 : i32
    %c0_i32_0 = arith.constant 0 : i32
    %c0_i32_1 = arith.constant 0 : i32
    return %c0_i32, %c0_i32_0 : i32, i32
  }
  func.func @transform_5(%arg0: i32) -> (i32, i32) {
    %c0_i32 = arith.constant 0 : i32
    %c0_i32_0 = arith.constant 0 : i32
    %c0_i32_1 = arith.constant 0 : i32
    return %c0_i32, %c0_i32_0 : i32, i32
  }
  func.func @transform_6(%arg0: i32) -> (i32, i32) {
    %c0_i32 = arith.constant 0 : i32
    %c0_i32_0 = arith.constant 0 : i32
    %c0_i32_1 = arith.constant 0 : i32
    return %c0_i32, %c0_i32_0 : i32, i32
  }
  func.func @transform_7(%arg0: i32) -> (i32, i32) {
    %c0_i32 = arith.constant 0 : i32
    %c0_i32_0 = arith.constant 0 : i32
    return %arg0, %c0_i32 : i32, i32
  }
}

</mosaic_0001>

<bundles_post_ra>
// kernel: tpu_custom_call.1
= control target key start
LH: loop header
LB: loop body
LE: loop exit
PB: predicated region body
PF: predicated region fallthrough
CT: control target
= control target key end

     0   :  { %12 = vsyncpa [#allocation4], 0  ;;  %s2727_s0 = inlined_call_operand.vmem [shape: bf16[1,64,32], index: 0, kind: input, shape index: {}]   ;;  %s2728_s1 = inlined_call_operand.hbm [shape: bf16[32,384], index: 1, kind: input, shape index: {}]   ;;  %s2729_s2 = inlined_call_operand.hbm [shape: bf16[128,384], index: 2, kind: input, shape index: {}]   ;;  %s2730_s3 = inlined_call_operand.hbm [shape: f32[1,384], index: 3, kind: input, shape index: {}]   ;;  %s2731_s4 = inlined_call_operand.vmem [shape: f32[1,128], index: 4, kind: input, shape index: {}]   ;;  %s2732_s5 = inlined_call_operand.vmem [shape: bf16[128,128], index: 5, kind: input, shape index: {}]   ;;  %s2733_s6 = inlined_call_operand.vmem [shape: f32[1,128], index: 6, kind: input, shape index: {}]   ;;  %s2734_s7 = inlined_call_operand.hbm [shape: f32[8,128], index: 7, kind: output, shape index: {}]  }
   0x1   :  { %13 = vsyncpa [#allocation7], 0 }
   0x2   :  { %14 = vsyncpa [#allocation5], 0  ;;  %s2127_s24 = smov [#allocation6]   ;;  %s2128_s26 = smov [#allocation3]  }
   0x3   :  { %s34_s25 = sshll.u32 %s2127_s24, 4  ;;  %s22_s27 = sshll.u32 %s2128_s26, 4  ;;  %s35_s25 = int_to_ptr.vmem [resolvable:$true] %s34_s25  ;;  %s2176_s27 = int_to_ptr.vmem [resolvable:$true] %s22_s27 }
   0x4   :  { %s2033_s30 = scalar_lea.hbm %s2729_s2, 3072 }
   0x5   :  { %p2034_p0 = scmp.ne.s32.totalorder %s2729_s2, %s2033_s30  ;;  %p2037_p1 = scmp.lt.u32.totalorder %s2033_s30, %s2729_s2 }
   0x7   :  { %p2039_p2 = pnand %p2037_p1, %p2034_p0 }
   0x9   :  { %2042 = shalt.err (!%p2039_p2)
}
   0xa   :  { %s2043_s12 = scalar_lea.vmem %s35_s25, 3072  ;;  %p2048_p4 = scmp.lt.s32.totalorder %s35_s25, %s35_s25 }
   0xb   :  { %p2044_p3 = scmp.ne.s32.totalorder %s35_s25, %s2043_s12  ;;  %p2049_p5 = scmp.lt.s32.totalorder %s2043_s12, %s2043_s12 }
   0xd   :  { %p2050_p6 = por %p2049_p5, %p2048_p4 }
   0xf   :  { %p2051_p7 = pnand %p2050_p6, %p2044_p3 }
  0x11   :  { %2054 = shalt.err (!%p2051_p7)
}
  0x12   :  { %s2129_s13 = smov 192   ;;  %s2130_s14 = smov 12  }
  0x13   :  { %40 = dma.hbm_to_vmem [thread:$0]  %s2729_s2, 3072, %s35_s25, [#allocation7], %s2129_s13, %s2129_s13, %s2130_s14  }
  0x14   :  { %s2055_s19 = scalar_lea.hbm %s2728_s1, 768 }
  0x15   :  { %p2056_p8 = scmp.ne.s32.totalorder %s2728_s1, %s2055_s19  ;;  %p2059_p9 = scmp.lt.u32.totalorder %s2055_s19, %s2728_s1 }
  0x17   :  { %p2061_p10 = pnand %p2059_p9, %p2056_p8 }
  0x19   :  { %2064 = shalt.err (!%p2061_p10)
}
  0x1a   :  { %s2065_s24 = scalar_lea.vmem %s2176_s27, 768  ;;  %p2070_p12 = scmp.lt.s32.totalorder %s2176_s27, %s2176_s27 }
  0x1b   :  { %p2066_p11 = scmp.ne.s32.totalorder %s2176_s27, %s2065_s24  ;;  %p2071_p13 = scmp.lt.s32.totalorder %s2065_s24, %s2065_s24 }
  0x1d   :  { %p2072_p0 = por %p2071_p13, %p2070_p12 }
  0x1f   :  { %p2073_p1 = pnand %p2072_p0, %p2066_p11 }
  0x21   :  { %2076 = shalt.err (!%p2073_p1)
}
  0x22   :  { %28 = dma.hbm_to_vmem [thread:$0]  %s2728_s1, 768, %s2176_s27, [#allocation4], %s2129_s13, %s2129_s13, %s2130_s14  }
  0x23   :  { %s2131_s26 = smov [#allocation8]   ;;  %s2077_s8 = scalar_lea.hbm %s2730_s3, 48 }
  0x24   :  { %s47_s28 = sshll.u32 %s2131_s26, 4  ;;  %p2078_p2 = scmp.ne.s32.totalorder %s2730_s3, %s2077_s8  ;;  %s48_s28 = int_to_ptr.vmem [resolvable:$true] %s47_s28 }
  0x25   :  { %p2081_p3 = scmp.lt.u32.totalorder %s2077_s8, %s2730_s3 }
  0x27   :  { %p2083_p4 = pnand %p2081_p3, %p2078_p2 }
  0x29   :  { %2086 = shalt.err (!%p2083_p4)
}
  0x2a   :  { %s2087_s15 = scalar_lea.vmem %s48_s28, 48  ;;  %s2091_s1 = scalar_lea.vmem %s48_s28, 64 }
  0x2b   :  { %p2088_p5 = scmp.ne.s32.totalorder %s48_s28, %s2087_s15  ;;  %p2092_p6 = scmp.lt.s32.totalorder %s48_s28, %s48_s28 }
  0x2c   :  { %p2093_p7 = scmp.lt.s32.totalorder %s2091_s1, %s2087_s15 }
  0x2e   :  { %p2094_p8 = por %p2093_p7, %p2092_p6 }
  0x30   :  { %p2095_p9 = pnand %p2094_p8, %p2088_p5 }
  0x32   :  { %2098 = shalt.err (!%p2095_p9)
}
  0x33   :  { %50 = dma.hbm_to_vmem [thread:$0]  %s2730_s3, 48, %s48_s28, [#allocation7]  }
  0x34   :  { %2121 = dma.done.wait [#allocation4], 768  }
  0x35   :  { %2122 = vsyncadd [#allocation4], 4294966528 }
  0x36   :  { %2123 = dma.done.wait [#allocation7], 3120  }
  0x37   :  { %2124 = vsyncadd [#allocation7], 4294964176  ;;  %v2735_v0 = vmov 0   ;;  %v1876_v1 = vld [vmem:[#allocation3 + $0x4] ss:$12 sps:$4 sm:$0xff]   ;;  %vm152_vm0 = vcmask 261120   ;;  %v85_v36 = vlaneseq }
  0x38   :  { %197 = vmatprep.mubr.bf16.mxu0 %v2735_v0  ;;  %v1878_v2 = vld [vmem:[#allocation3] ss:$12 sps:$4 sm:$0xff]   ;;  %165 = vmatprep.subr.bf16.mxu0 %v1876_v1  ;;  %v1879_v3 = vld [vmem:[#allocation3 + $0x1c] ss:$12 sps:$4 sm:$0xff]   ;;  %v1881_v4 = vld [vmem:[#allocation3 + $0x18] ss:$12 sps:$4 sm:$0xff]  }
  0x39   :  { %166 = vmatpush1.bf16.msra.mxu0 %v1878_v2  ;;  %v1882_v5 = vld [vmem:[%s2727_s0] sm:$0xff]   ;;  %v2226_v7 = vld [vmem:[#allocation6] ss:$12 sps:$4 sm:$0xff]   ;;  %v2229_v8 = vld [vmem:[#allocation6 + $0x1c] ss:$12 sps:$4 sm:$0xff]   ;;  %v2737_v20 = vmov 0.0  }
  0x3a   :  { %167 = vmatprep.subr.bf16.mxu0 %v1879_v3  ;;  %v2223_v6 = vld [vmem:[#allocation6 + $0x4] ss:$12 sps:$4 sm:$0xff]   ;;  %1679 = vmatprep.mubr.msk.bf16.mxu1 %vm152_vm0, %v1882_v5  ;;  %v2237_v11 = vld [vmem:[#allocation6 + $0x34] ss:$12 sps:$4 sm:$0xff]   ;;  %v1889_v12 = vld [vmem:[%s2727_s0 + $0x8] sm:$0xff]   ;;  %vm2134_vm1 = vmmov 0  }
  0x3b   :  { %v2232_v9 = vld [vmem:[#allocation6 + $0x18] ss:$12 sps:$4 sm:$0xff]   ;;  %v1901_v13 = vld [vmem:[#allocation3 + $0x20] ss:$12 sps:$4 sm:$0xff]   ;;  %v2248_v16 = vld [vmem:[#allocation6 + $0x48] ss:$12 sps:$4 sm:$0xff]  }
  0x3c   :  { %v1897_v10 = vld [vmem:[#allocation3 + $0x8] ss:$12 sps:$4 sm:$0xff]   ;;  %v2243_v14 = vld [vmem:[#allocation6 + $0x30] ss:$12 sps:$4 sm:$0xff]   ;;  %v2251_v17 = vld [vmem:[#allocation6 + $0x8] ss:$12 sps:$4 sm:$0xff]  }
  0x3d   :  { %168 = vmatpush1.bf16.msra.mxu0 %v1881_v4  ;;  %1675 = vmatprep.subr.bf16.mxu1 %v1897_v10  ;;  %v2246_v15 = vld [vmem:[#allocation6 + $0x4c] ss:$12 sps:$4 sm:$0xff]   ;;  %v1896_v18 = vld [vmem:[%s2727_s0 + $0x10] sm:$0xff]   ;;  %v2272_v23 = vld [vmem:[#allocation6 + $0x7c] ss:$12 sps:$4 sm:$0xff]   ;;  %v86_v37 = vshrl.u32 %v85_v36, 7 }
  0x3e   :  { %500 = vmatprep.subr.bf16.mxu0 %v2223_v6  ;;  %1676 = vmatpush3.bf16.msra.mxu1 %v1897_v10  ;;  %v2259_v19 = vld [vmem:[#allocation6 + $0x64] ss:$12 sps:$4 sm:$0xff]   ;;  %v2264_v21 = vld [vmem:[#allocation6 + $0x20] ss:$12 sps:$4 sm:$0xff]   ;;  %v2304_v31 = vld [vmem:[#allocation6 + $0x68] ss:$12 sps:$4 sm:$0xff]  }
  0x3f   :  { %1677 = vmatprep.subr.bf16.mxu1 %v1901_v13  ;;  %v2268_v22 = vld [vmem:[#allocation6 + $0x60] ss:$12 sps:$4 sm:$0xff]   ;;  %v2274_v24 = vld [vmem:[#allocation6 + $0x78] ss:$12 sps:$4 sm:$0xff]   ;;  %v2289_v28 = vld [vmem:[#allocation6 + $0x50] ss:$12 sps:$4 sm:$0xff]  }
  0x40   :  { %1530 = vmatmul.mubr.msk.bf16.vlgmr.msra.gmra.mrb[0].mxu0 %vm152_vm0, %v1882_v5  ;;  %v2278_v25 = vld [vmem:[#allocation6 + $0x38] ss:$12 sps:$4 sm:$0xff]   ;;  %v1905_v26 = vld [vmem:[%s2727_s0 + $0x18] sm:$0xff]   ;;  %v2285_v27 = vld [vmem:[#allocation6 + $0x94] ss:$12 sps:$4 sm:$0xff]   ;;  %v87_v38 = vsub.s32 0, %v86_v37 }
  0x41   :  { %501 = vmatpush1.bf16.msra.mxu0 %v2226_v7  ;;  %207 = vmatprep.mubr.bf16.mxu0 %v2735_v0  ;;  %v2291_v29 = vld [vmem:[#allocation6 + $0x90] ss:$12 sps:$4 sm:$0xff]   ;;  %v2294_v30 = vld [vmem:[#allocation6 + $0xac] ss:$12 sps:$4 sm:$0xff]   ;;  %v2307_v32 = vld [vmem:[#allocation6 + $0xa8] ss:$12 sps:$4 sm:$0xff]  }
  0x42   :  { %502 = vmatprep.subr.bf16.mxu0 %v2229_v8  ;;  %1678 = vmatpush3.bf16.msra.mxu1 %v1901_v13  ;;  %v2313_v33 = vld [vmem:[#allocation6 + $0x80] ss:$12 sps:$4 sm:$0xff]   ;;  %v2320_v34 = vld [vmem:[#allocation6 + $0x98] ss:$12 sps:$4 sm:$0xff]   ;;  %v2327_v35 = vld [vmem:[#allocation6 + $0xb0] ss:$12 sps:$4 sm:$0xff]  }
  0x43   :  { %1687 = vmatprep.subr.bf16.mxu1 %v2737_v20  ;;  %v83_v39 = vld [vmem:[#allocation8] sm:$0x7]  ;;  %v91_v40 = vsub.s32 1, %v86_v37  ;;  %v95_v49 = vsub.s32 2, %v86_v37  ;;  %s2135_s13 = smov [#allocation9]  }
  0x44   :  { %v88_v42 = vrot.slane %v83_v39, %v87_v38  ;;  %s1503_s14 = sshll.u32 %s2135_s13, 4  ;;  %s1504_s14 = int_to_ptr.vmem [resolvable:$true] %s1503_s14 }
  0x45   :  { %503 = vmatpush1.bf16.msra.mxu0 %v2232_v9  ;;  %1680 = vmatmul.mubr.msk.bf16.vlgmr.msra.gmra.mrb[0].mxu1 %vm152_vm0, %v1889_v12  ;;  %v92_v44 = vrot.slane %v83_v39, %v91_v40  ;;  %v96_v51 = vrot.slane %v83_v39, %v95_v49  ;;  %p2104_p11 = scmp.lt.s32.totalorder %s1504_s14, %s1504_s14 }
  0x46   :  { %504 = vmatprep.subr.bf16.mxu0 %v2237_v11  ;;  %1688 = vmatpush3.bf16.msra.mxu1 %v2251_v17 }
  0x47   :  { %1683 = vmatprep.mubr.msk.bf16.mxu1 %vm152_vm0, %v1896_v18  ;;  %1689 = vmatprep.subr.bf16.mxu1 %v2737_v20 }
  0x48   :  { %1531 = vmatmul.mubr.msk.bf16.gmra.mrb[4].mxu0 %vm152_vm0, %v1889_v12 }
  0x49   :  { %505 = vmatpush1.bf16.msra.mxu0 %v2243_v14  ;;  %217 = vmatprep.mubr.bf16.mxu0 %v2735_v0 }
  0x4a   :  { %506 = vmatprep.subr.bf16.mxu0 %v2246_v15  ;;  %1690 = vmatpush3.bf16.msra.mxu1 %v2264_v21 }
  0x4b   :  { %1691 = vmatprep.subr.bf16.mxu1 %v2737_v20 }
  0x4d   :  { %507 = vmatpush1.bf16.msra.mxu0 %v2248_v16  ;;  %1684 = vmatmul.mubr.msk.bf16.gmra.mrb[4].mxu1 %vm152_vm0, %v1905_v26 }
  0x4e   :  { %508 = vmatprep.subr.bf16.mxu0 %v2259_v19  ;;  %1692 = vmatpush3.bf16.msra.mxu1 %v2278_v25 }
  0x4f   :  { %1703 = vmatprep.mubr.msk.bf16.mxu1 %vm2134_vm1, %v2737_v20  ;;  %1693 = vmatprep.subr.bf16.mxu1 %v2737_v20 }
  0x50   :  { %1532 = vmatmul.mubr.msk.bf16.gmra.mrb[8].mxu0 %vm152_vm0, %v1896_v18 }
  0x51   :  { %509 = vmatpush1.bf16.msra.mxu0 %v2268_v22  ;;  %227 = vmatprep.mubr.bf16.mxu0 %v2735_v0 }
  0x52   :  { %510 = vmatprep.subr.bf16.mxu0 %v2272_v23  ;;  %1694 = vmatpush3.bf16.msra.mxu1 %v2289_v28 }
  0x53   :  { %1695 = vmatprep.subr.bf16.mxu1 %v2737_v20 }
  0x55   :  { %511 = vmatpush1.bf16.msra.mxu0 %v2274_v24 }
  0x56   :  { %512 = vmatprep.subr.bf16.mxu0 %v2285_v27  ;;  %1696 = vmatpush3.bf16.msra.mxu1 %v2304_v31 }
  0x57   :  { %1697 = vmatprep.subr.bf16.mxu1 %v2737_v20 }
  0x58   :  { %1533 = vmatmul.mubr.msk.bf16.gmra.mrb[12].mxu0 %vm152_vm0, %v1905_v26 }
  0x59   :  { %513 = vmatpush1.bf16.msra.mxu0 %v2291_v29  ;;  %532 = vmatprep.mubr.bf16.mxu0 %v2735_v0 }
  0x5a   :  { %514 = vmatprep.subr.bf16.mxu0 %v2294_v30  ;;  %1698 = vmatpush3.bf16.msra.mxu1 %v2313_v33 }
  0x5b   :  { %1699 = vmatprep.subr.bf16.mxu1 %v2737_v20 }
  0x5d   :  { %515 = vmatpush1.bf16.msra.mxu0 %v2307_v32 }
  0x5e   :  { %610 = vmatprep.subr.bf16.mxu0 %v2223_v6  ;;  %1700 = vmatpush3.bf16.msra.mxu1 %v2320_v34 }
  0x5f   :  { %1701 = vmatprep.subr.bf16.mxu1 %v2737_v20 }
  0x60   :  { %533 = vmatmul.mubr.bf16.vlgmr.msra.gmra.mrb[16].mxu0 %v2735_v0 }
  0x61   :  { %611 = vmatpush1.bf16.msra.mxu0 %v2226_v7  ;;  %642 = vmatprep.mubr.bf16.mxu0 %v2735_v0 }
  0x62   :  { %612 = vmatprep.subr.bf16.mxu0 %v2229_v8  ;;  %1702 = vmatpush3.bf16.msra.mxu1 %v2327_v35 }
  0x63   :  { %1707 = vmatprep.subr.bf16.mxu1 %v2737_v20 }
  0x65   :  { %613 = vmatpush1.bf16.msra.mxu0 %v2232_v9  ;;  %1704 = vmatmul.mubr.bf16.vlgmr.msra.gmra.mrb[8].mxu1 %v2735_v0 }
  0x66   :  { %614 = vmatprep.subr.bf16.mxu0 %v2237_v11  ;;  %1708 = vmatpush3.bf16.msra.mxu1 %v2251_v17 }
  0x67   :  { %1723 = vmatprep.mubr.msk.bf16.mxu1 %vm2134_vm1, %v2737_v20  ;;  %1709 = vmatprep.subr.bf16.mxu1 %v2737_v20 }
  0x69   :  { %615 = vmatpush1.bf16.msra.mxu0 %v2243_v14 }
  0x6a   :  { %616 = vmatprep.subr.bf16.mxu0 %v2246_v15  ;;  %1710 = vmatpush3.bf16.msra.mxu1 %v2264_v21 }
  0x6b   :  { %1711 = vmatprep.subr.bf16.mxu1 %v2737_v20 }
  0x6d   :  { %617 = vmatpush1.bf16.msra.mxu0 %v2248_v16 }
  0x6e   :  { %618 = vmatprep.subr.bf16.mxu0 %v2259_v19  ;;  %1712 = vmatpush3.bf16.msra.mxu1 %v2278_v25 }
  0x6f   :  { %1713 = vmatprep.subr.bf16.mxu1 %v2737_v20 }
  0x71   :  { %619 = vmatpush1.bf16.msra.mxu0 %v2268_v22 }
  0x72   :  { %620 = vmatprep.subr.bf16.mxu0 %v2272_v23  ;;  %1714 = vmatpush3.bf16.msra.mxu1 %v2289_v28 }
  0x73   :  { %1715 = vmatprep.subr.bf16.mxu1 %v2737_v20 }
  0x75   :  { %621 = vmatpush1.bf16.msra.mxu0 %v2274_v24 }
  0x76   :  { %622 = vmatprep.subr.bf16.mxu0 %v2285_v27  ;;  %1716 = vmatpush3.bf16.msra.mxu1 %v2304_v31 }
  0x77   :  { %1717 = vmatprep.subr.bf16.mxu1 %v2737_v20 }
  0x79   :  { %623 = vmatpush1.bf16.msra.mxu0 %v2291_v29 }
  0x7a   :  { %624 = vmatprep.subr.bf16.mxu0 %v2294_v30  ;;  %1718 = vmatpush3.bf16.msra.mxu1 %v2313_v33 }
  0x7b   :  { %1719 = vmatprep.subr.bf16.mxu1 %v2737_v20 }
  0x7d   :  { %625 = vmatpush1.bf16.msra.mxu0 %v2307_v32 }
  0x7e   :  { %720 = vmatprep.subr.bf16.mxu0 %v2223_v6  ;;  %1720 = vmatpush3.bf16.msra.mxu1 %v2320_v34 }
  0x7f   :  { %1721 = vmatprep.subr.bf16.mxu1 %v2737_v20 }
  0x82   :  { %1722 = vmatpush3.bf16.msra.mxu1 %v2327_v35 }
  0x83   :  { %1727 = vmatprep.subr.bf16.mxu1 %v2737_v20 }
 0x113   :  { %v199_v41 = vpop.f32.mrb[0].mxu0 }
 0x114   :  { %v201_v43 = vpop.f32.mrb[1].mxu0 }
 0x115   :  { %v203_v45 = vpop.f32.mrb[2].mxu0 }
 0x116   :  { %v2365_v46 = vadd.f32 %v203_v45, %v88_v42  ;;  %v205_v47 = vpop.f32.mrb[3].mxu0 }
 0x117   :  { %v2367_v48 = vadd.f32 %v205_v47, %v92_v44 }
 0x118   :  { %v1681_v58 = vpop.f32.mrb[0].mxu1 }
 0x119   :  { %v2377_v60 = vadd.f32 %v1681_v58, %v96_v51  ;;  %v272_v61 = vpop.f32.mrb[1].mxu1 }
 0x11a   :  { %v1682_v62 = vpop.f32.mrb[2].mxu1 }
 0x11b   :  { %v209_v50 = vpop.f32.mrb[4].mxu0  ;;  %v2379_v63 = vadd.f32 %v1682_v62, %v96_v51  ;;  %v275_v1 = vpop.f32.mrb[3].mxu1 }
 0x11c   :  { %v2369_v52 = vadd.f32 %v209_v50, %v88_v42  ;;  %v211_v53 = vpop.f32.mrb[5].mxu0  ;;  %v2381_v2 = vadd.f32 %v275_v1, %v96_v51 }
 0x11d   :  { %v2371_v54 = vadd.f32 %v211_v53, %v92_v44  ;;  %v213_v55 = vpop.f32.mrb[6].mxu0 }
 0x11e   :  { %v2373_v56 = vadd.f32 %v213_v55, %v88_v42  ;;  %v215_v57 = vpop.f32.mrb[7].mxu0 }
 0x11f   :  { %v2375_v59 = vadd.f32 %v215_v57, %v92_v44 }
 0x120   :  { %v1685_v26 = vpop.f32.mrb[4].mxu1 }
 0x121   :  { %v2391_v37 = vadd.f32 %v1685_v26, %v96_v51  ;;  %v288_v38 = vpop.f32.mrb[5].mxu1 }
 0x122   :  { %v2393_v39 = vadd.f32 %v288_v38, %v96_v51  ;;  %v1686_v40 = vpop.f32.mrb[6].mxu1 }
 0x123   :  { %v219_v3 = vpop.f32.mrb[8].mxu0  ;;  %2739 = vst [vmem:[#allocation13_spill] sm:$0xff] %v2391_v37  ;;  %v2395_v45 = vadd.f32 %v1686_v40, %v96_v51  ;;  %v291_v47 = vpop.f32.mrb[7].mxu1 }
 0x124   :  { %v2383_v4 = vadd.f32 %v219_v3, %v88_v42  ;;  %v221_v5 = vpop.f32.mrb[9].mxu0  ;;  %v2397_v49 = vadd.f32 %v291_v47, %v96_v51 }
 0x125   :  { %v2385_v10 = vadd.f32 %v221_v5, %v92_v44  ;;  %v223_v12 = vpop.f32.mrb[10].mxu0  ;;  %2740 = vst [vmem:[#allocation14_spill] sm:$0xff] %v2395_v45  ;;  %v200_v5 = vadd.f32 %v199_v41, %v88_v42  ;;  %v2410_v41 = vld [vmem:[%s2731_s4] ss:$0 sm:$0xff] }
 0x126   :  { %v2387_v13 = vadd.f32 %v223_v12, %v88_v42  ;;  %v225_v18 = vpop.f32.mrb[11].mxu0  ;;  %v202_v12 = vadd.f32 %v201_v43, %v92_v44 }
 0x127   :  { %v2389_v36 = vadd.f32 %v225_v18, %v92_v44 }
 0x12b   :  { %v229_v50 = vpop.f32.mrb[12].mxu0 }
 0x12c   :  { %v2399_v53 = vadd.f32 %v229_v50, %v88_v42  ;;  %v231_v55 = vpop.f32.mrb[13].mxu0 }
 0x12d   :  { %v2401_v57 = vadd.f32 %v231_v55, %v92_v44  ;;  %v233_v58 = vpop.f32.mrb[14].mxu0 }
 0x12e   :  { %v2403_v62 = vadd.f32 %v233_v58, %v88_v42  ;;  %v235_v1 = vpop.f32.mrb[15].mxu0 }
 0x12f   :  { %2741 = vst [vmem:[#allocation15_spill] sm:$0xff] %v2401_v57  ;;  %v2405_v3 = vadd.f32 %v235_v1, %v92_v44 }
 0x130   :  { %2742 = vst [vmem:[#allocation16_spill] sm:$0xff] %v2403_v62 }
 0x133   :  { %v534_v18 = vpop.f32.mrb[16].mxu0 }
 0x134   :  { %v581_v26 = vadd.f32 %v534_v18, %v200_v5  ;;  %v536_v38 = vpop.f32.mrb[17].mxu0 }
 0x135   :  { %v588_v40 = vadd.f32 %v536_v38, %v202_v12  ;;  %v538_v47 = vpop.f32.mrb[18].mxu0 }
 0x136   :  { %v1563_v0 = vmul.f32 -1.442695, %v581_v26  ;;  %v539_v20 = vpop.f32.mrb[19].mxu0 }
 0x137   :  { %v1564_v55 = vmul.f32 -1.442695, %v588_v40  ;;  %v273_v20 = vadd.f32 %v272_v61, %v96_v51  ;;  %v2743_v51 = vmov 0.0   ;;  %v2744_v61 = vmov 0  }
 0x138   :  { %1928 = vpow2.f32 %v1563_v0  ;;  %v575_v50 = vpop.f32.mrb[8].mxu1 }
 0x139   :  { %v1705_v45 = vpop.f32.mrb[9].mxu1  ;;  %1930 = vpow2.f32 %v1564_v55  ;;  %v595_v42 = vadd.f32 %v2410_v41, %v575_v50 }
 0x13a   :  { %v578_v37 = vpop.f32.mrb[10].mxu1 }
 0x13b   :  { %v1706_v57 = vpop.f32.mrb[11].mxu1 }
 0x142   :  { %v1929_v58 = vpop.eup %1928 }
 0x143   :  { %v585_v62 = vadd.f32 1.0, %v1929_v58  ;;  %v1931_v43 = vpop.eup %1930 }
 0x144   :  { %v592_v1 = vadd.f32 1.0, %v1931_v43 }
 0x145   :  { %1932 = vrcp.f32 %v585_v62 }
 0x14f   :  { %v1933_v44 = vpop.eup %1932 }
 0x150   :  { %v596_v0 = vmul.f32 %v1933_v44, %v595_v42 }
 0x152   :  { %v597_v45 = vadd.f32 %v596_v0, %v273_v20 }
 0x154   :  { %1934 = vtanh.f32 %v597_v45 }
 0x155   :  { %1936 = vrcp.f32 %v592_v1 }
 0x15e   :  { %v1935_v37 = vpop.eup %1934 }
 0x15f   :  { %v599_v57 = vsub.f32 0.0, %v1935_v37  ;;  %v1937_v5 = vpop.eup %1936 }
 0x161   :  { %v600_v12 = vmul.f32 %v1937_v5, %v599_v57 }
 0x163   :  { %v2413_v62 = vadd.f32 %v1935_v37, %v600_v12 }
 0x165   :  { %v609_v18 = vpack.c.bf16 %v2413_v62, %v2413_v62 }
 0x167   :  { %643 = vmatmul.mubr.bf16.vlgmr.msra.gmra.mrb[20].mxu0 %v609_v18  ;;  %1724 = vmatmul.mubr.bf16.vlgmr.msra.gmra.mrb[12].mxu1 %v609_v18 }
 0x168   :  { %721 = vmatpush1.bf16.msra.mxu0 %v2226_v7  ;;  %1728 = vmatpush3.bf16.msra.mxu1 %v2251_v17 }
 0x169   :  { %722 = vmatprep.subr.bf16.mxu0 %v2229_v8  ;;  %1729 = vmatprep.subr.bf16.mxu1 %v2743_v51 }
 0x16a   :  { %752 = vmatprep.mubr.bf16.mxu0 %v2744_v61  ;;  %1743 = vmatprep.mubr.msk.bf16.mxu1 %vm2134_vm1, %v2743_v51 }
 0x16c   :  { %723 = vmatpush1.bf16.msra.mxu0 %v2232_v9  ;;  %1730 = vmatpush3.bf16.msra.mxu1 %v2264_v21 }
 0x16d   :  { %724 = vmatprep.subr.bf16.mxu0 %v2237_v11  ;;  %1731 = vmatprep.subr.bf16.mxu1 %v2743_v51 }
 0x170   :  { %725 = vmatpush1.bf16.msra.mxu0 %v2243_v14  ;;  %1732 = vmatpush3.bf16.msra.mxu1 %v2278_v25 }
 0x171   :  { %726 = vmatprep.subr.bf16.mxu0 %v2246_v15  ;;  %1733 = vmatprep.subr.bf16.mxu1 %v2743_v51 }
 0x174   :  { %727 = vmatpush1.bf16.msra.mxu0 %v2248_v16  ;;  %1734 = vmatpush3.bf16.msra.mxu1 %v2289_v28 }
 0x175   :  { %728 = vmatprep.subr.bf16.mxu0 %v2259_v19  ;;  %1735 = vmatprep.subr.bf16.mxu1 %v2743_v51 }
 0x178   :  { %729 = vmatpush1.bf16.msra.mxu0 %v2268_v22  ;;  %1736 = vmatpush3.bf16.msra.mxu1 %v2304_v31 }
 0x179   :  { %730 = vmatprep.subr.bf16.mxu0 %v2272_v23  ;;  %1737 = vmatprep.subr.bf16.mxu1 %v2743_v51 }
 0x17c   :  { %731 = vmatpush1.bf16.msra.mxu0 %v2274_v24  ;;  %1738 = vmatpush3.bf16.msra.mxu1 %v2313_v33 }
 0x17d   :  { %732 = vmatprep.subr.bf16.mxu0 %v2285_v27  ;;  %1739 = vmatprep.subr.bf16.mxu1 %v2743_v51 }
 0x180   :  { %733 = vmatpush1.bf16.msra.mxu0 %v2291_v29  ;;  %1740 = vmatpush3.bf16.msra.mxu1 %v2320_v34 }
 0x181   :  { %734 = vmatprep.subr.bf16.mxu0 %v2294_v30  ;;  %1741 = vmatprep.subr.bf16.mxu1 %v2743_v51 }
 0x184   :  { %735 = vmatpush1.bf16.msra.mxu0 %v2307_v32  ;;  %1742 = vmatpush3.bf16.msra.mxu1 %v2327_v35 }
 0x185   :  { %830 = vmatprep.subr.bf16.mxu0 %v2223_v6  ;;  %1747 = vmatprep.subr.bf16.mxu1 %v2743_v51 }
 0x23a   :  { %v644_v26 = vpop.f32.mrb[20].mxu0  ;;  %v685_v38 = vpop.f32.mrb[12].mxu1 }
 0x23b   :  { %v691_v40 = vadd.f32 %v644_v26, %v2365_v46  ;;  %v646_v47 = vpop.f32.mrb[21].mxu0  ;;  %v1725_v50 = vpop.f32.mrb[13].mxu1  ;;  %v705_v57 = vadd.f32 %v2410_v41, %v685_v38 }
 0x23c   :  { %v698_v55 = vadd.f32 %v646_v47, %v2367_v48  ;;  %v648_v58 = vpop.f32.mrb[22].mxu0  ;;  %v688_v42 = vpop.f32.mrb[14].mxu1 }
 0x23d   :  { %v1565_v43 = vmul.f32 -1.442695, %v691_v40  ;;  %v649_v44 = vpop.f32.mrb[23].mxu0  ;;  %v1726_v20 = vpop.f32.mrb[15].mxu1 }
 0x23e   :  { %v1566_v0 = vmul.f32 -1.442695, %v698_v55 }
 0x23f   :  { %1938 = vpow2.f32 %v1565_v43 }
 0x240   :  { %1940 = vpow2.f32 %v1566_v0 }
 0x249   :  { %v1939_v1 = vpop.eup %1938 }
 0x24a   :  { %v695_v45 = vadd.f32 1.0, %v1939_v1  ;;  %v1941_v37 = vpop.eup %1940 }
 0x24b   :  { %v702_v18 = vadd.f32 1.0, %v1941_v37 }
 0x24c   :  { %1942 = vrcp.f32 %v695_v45 }
 0x256   :  { %v1943_v5 = vpop.eup %1942 }
 0x257   :  { %v706_v46 = vmul.f32 %v1943_v5, %v705_v57 }
 0x259   :  { %v707_v12 = vadd.f32 %v706_v46, %v2381_v2 }
 0x25b   :  { %1944 = vtanh.f32 %v707_v12 }
 0x25c   :  { %1946 = vrcp.f32 %v702_v18 }
 0x265   :  { %v1945_v48 = vpop.eup %1944 }
 0x266   :  { %v709_v26 = vsub.f32 %v2413_v62, %v1945_v48  ;;  %v1947_v40 = vpop.eup %1946 }
 0x268   :  { %v710_v47 = vmul.f32 %v1947_v40, %v709_v26 }
 0x26a   :  { %v2457_v50 = vadd.f32 %v1945_v48, %v710_v47 }
 0x26c   :  { %v719_v55 = vpack.c.bf16 %v2457_v50, %v2457_v50 }
 0x26e   :  { %753 = vmatmul.mubr.bf16.vlgmr.msra.gmra.mrb[24].mxu0 %v719_v55  ;;  %1744 = vmatmul.mubr.bf16.vlgmr.msra.gmra.mrb[16].mxu1 %v719_v55 }
 0x26f   :  { %831 = vmatpush1.bf16.msra.mxu0 %v2226_v7  ;;  %1748 = vmatpush3.bf16.msra.mxu1 %v2251_v17 }
 0x270   :  { %832 = vmatprep.subr.bf16.mxu0 %v2229_v8  ;;  %1749 = vmatprep.subr.bf16.mxu1 %v2743_v51 }
 0x271   :  { %862 = vmatprep.mubr.bf16.mxu0 %v2744_v61  ;;  %1763 = vmatprep.mubr.msk.bf16.mxu1 %vm2134_vm1, %v2743_v51 }
 0x273   :  { %833 = vmatpush1.bf16.msra.mxu0 %v2232_v9  ;;  %1750 = vmatpush3.bf16.msra.mxu1 %v2264_v21 }
 0x274   :  { %834 = vmatprep.subr.bf16.mxu0 %v2237_v11  ;;  %1751 = vmatprep.subr.bf16.mxu1 %v2743_v51 }
 0x277   :  { %835 = vmatpush1.bf16.msra.mxu0 %v2243_v14  ;;  %1752 = vmatpush3.bf16.msra.mxu1 %v2278_v25 }
 0x278   :  { %836 = vmatprep.subr.bf16.mxu0 %v2246_v15  ;;  %1753 = vmatprep.subr.bf16.mxu1 %v2743_v51 }
 0x27b   :  { %837 = vmatpush1.bf16.msra.mxu0 %v2248_v16  ;;  %1754 = vmatpush3.bf16.msra.mxu1 %v2289_v28 }
 0x27c   :  { %838 = vmatprep.subr.bf16.mxu0 %v2259_v19  ;;  %1755 = vmatprep.subr.bf16.mxu1 %v2743_v51 }
 0x27f   :  { %839 = vmatpush1.bf16.msra.mxu0 %v2268_v22  ;;  %1756 = vmatpush3.bf16.msra.mxu1 %v2304_v31 }
 0x280   :  { %840 = vmatprep.subr.bf16.mxu0 %v2272_v23  ;;  %1757 = vmatprep.subr.bf16.mxu1 %v2743_v51 }
 0x283   :  { %841 = vmatpush1.bf16.msra.mxu0 %v2274_v24  ;;  %1758 = vmatpush3.bf16.msra.mxu1 %v2313_v33 }
 0x284   :  { %842 = vmatprep.subr.bf16.mxu0 %v2285_v27  ;;  %1759 = vmatprep.subr.bf16.mxu1 %v2743_v51 }
 0x287   :  { %843 = vmatpush1.bf16.msra.mxu0 %v2291_v29  ;;  %1760 = vmatpush3.bf16.msra.mxu1 %v2320_v34 }
 0x288   :  { %844 = vmatprep.subr.bf16.mxu0 %v2294_v30  ;;  %1761 = vmatprep.subr.bf16.mxu1 %v2743_v51 }
 0x28b   :  { %845 = vmatpush1.bf16.msra.mxu0 %v2307_v32  ;;  %1762 = vmatpush3.bf16.msra.mxu1 %v2327_v35 }
 0x28c   :  { %940 = vmatprep.subr.bf16.mxu0 %v2223_v6  ;;  %1767 = vmatprep.subr.bf16.mxu1 %v2743_v51 }
 0x341   :  { %v754_v2 = vpop.f32.mrb[24].mxu0  ;;  %v795_v38 = vpop.f32.mrb[16].mxu1 }
 0x342   :  { %v801_v58 = vadd.f32 %v754_v2, %v2369_v52  ;;  %v756_v42 = vpop.f32.mrb[25].mxu0  ;;  %v1745_v43 = vpop.f32.mrb[17].mxu1  ;;  %v815_v18 = vadd.f32 %v2410_v41, %v795_v38 }
 0x343   :  { %v808_v44 = vadd.f32 %v756_v42, %v2371_v54  ;;  %v758_v20 = vpop.f32.mrb[26].mxu0  ;;  %v798_v0 = vpop.f32.mrb[18].mxu1 }
 0x344   :  { %v1567_v1 = vmul.f32 -1.442695, %v801_v58  ;;  %v759_v45 = vpop.f32.mrb[27].mxu0  ;;  %v1746_v37 = vpop.f32.mrb[19].mxu1 }
 0x345   :  { %v1568_v57 = vmul.f32 -1.442695, %v808_v44 }
 0x346   :  { %1948 = vpow2.f32 %v1567_v1 }
 0x347   :  { %1950 = vpow2.f32 %v1568_v57 }
 0x350   :  { %v1949_v5 = vpop.eup %1948 }
 0x351   :  { %v805_v46 = vadd.f32 1.0, %v1949_v5  ;;  %v1951_v12 = vpop.eup %1950 }
 0x352   :  { %v812_v40 = vadd.f32 1.0, %v1951_v12 }
 0x353   :  { %1952 = vrcp.f32 %v805_v46 }
 0x35d   :  { %v1953_v48 = vpop.eup %1952 }
 0x35e   :  { %v816_v52 = vmul.f32 %v1953_v48, %v815_v18 }
 0x360   :  { %v817_v26 = vadd.f32 %v816_v52, %v2377_v60 }
 0x362   :  { %1954 = vtanh.f32 %v817_v26 }
 0x363   :  { %1956 = vrcp.f32 %v812_v40 }
 0x36c   :  { %v1955_v54 = vpop.eup %1954 }
 0x36d   :  { %v819_v47 = vsub.f32 %v2457_v50, %v1955_v54  ;;  %v1957_v55 = vpop.eup %1956 }
 0x36f   :  { %v820_v2 = vmul.f32 %v1957_v55, %v819_v47 }
 0x371   :  { %v2501_v58 = vadd.f32 %v1955_v54, %v820_v2 }
 0x373   :  { %v829_v42 = vpack.c.bf16 %v2501_v58, %v2501_v58 }
 0x375   :  { %863 = vmatmul.mubr.bf16.vlgmr.msra.gmra.mrb[28].mxu0 %v829_v42  ;;  %1764 = vmatmul.mubr.bf16.vlgmr.msra.gmra.mrb[20].mxu1 %v829_v42 }
 0x376   :  { %941 = vmatpush1.bf16.msra.mxu0 %v2226_v7  ;;  %1768 = vmatpush3.bf16.msra.mxu1 %v2251_v17 }
 0x377   :  { %942 = vmatprep.subr.bf16.mxu0 %v2229_v8  ;;  %1769 = vmatprep.subr.bf16.mxu1 %v2743_v51 }
 0x378   :  { %972 = vmatprep.mubr.bf16.mxu0 %v2744_v61  ;;  %1783 = vmatprep.mubr.msk.bf16.mxu1 %vm2134_vm1, %v2743_v51 }
 0x37a   :  { %943 = vmatpush1.bf16.msra.mxu0 %v2232_v9  ;;  %1770 = vmatpush3.bf16.msra.mxu1 %v2264_v21 }
 0x37b   :  { %944 = vmatprep.subr.bf16.mxu0 %v2237_v11  ;;  %1771 = vmatprep.subr.bf16.mxu1 %v2743_v51 }
 0x37e   :  { %945 = vmatpush1.bf16.msra.mxu0 %v2243_v14  ;;  %1772 = vmatpush3.bf16.msra.mxu1 %v2278_v25 }
 0x37f   :  { %946 = vmatprep.subr.bf16.mxu0 %v2246_v15  ;;  %1773 = vmatprep.subr.bf16.mxu1 %v2743_v51 }
 0x382   :  { %947 = vmatpush1.bf16.msra.mxu0 %v2248_v16  ;;  %1774 = vmatpush3.bf16.msra.mxu1 %v2289_v28 }
 0x383   :  { %948 = vmatprep.subr.bf16.mxu0 %v2259_v19  ;;  %1775 = vmatprep.subr.bf16.mxu1 %v2743_v51 }
 0x386   :  { %949 = vmatpush1.bf16.msra.mxu0 %v2268_v22  ;;  %1776 = vmatpush3.bf16.msra.mxu1 %v2304_v31 }
 0x387   :  { %950 = vmatprep.subr.bf16.mxu0 %v2272_v23  ;;  %1777 = vmatprep.subr.bf16.mxu1 %v2743_v51 }
 0x38a   :  { %951 = vmatpush1.bf16.msra.mxu0 %v2274_v24  ;;  %1778 = vmatpush3.bf16.msra.mxu1 %v2313_v33 }
 0x38b   :  { %952 = vmatprep.subr.bf16.mxu0 %v2285_v27  ;;  %1779 = vmatprep.subr.bf16.mxu1 %v2743_v51 }
 0x38e   :  { %953 = vmatpush1.bf16.msra.mxu0 %v2291_v29  ;;  %1780 = vmatpush3.bf16.msra.mxu1 %v2320_v34 }
 0x38f   :  { %954 = vmatprep.subr.bf16.mxu0 %v2294_v30  ;;  %1781 = vmatprep.subr.bf16.mxu1 %v2743_v51 }
 0x392   :  { %955 = vmatpush1.bf16.msra.mxu0 %v2307_v32  ;;  %1782 = vmatpush3.bf16.msra.mxu1 %v2327_v35 }
 0x393   :  { %1050 = vmatprep.subr.bf16.mxu0 %v2223_v6  ;;  %1787 = vmatprep.subr.bf16.mxu1 %v2743_v51 }
 0x448   :  { %v864_v60 = vpop.f32.mrb[28].mxu0  ;;  %v905_v38 = vpop.f32.mrb[20].mxu1 }
 0x449   :  { %v911_v43 = vadd.f32 %v864_v60, %v2373_v56  ;;  %v866_v44 = vpop.f32.mrb[29].mxu0  ;;  %v1765_v20 = vpop.f32.mrb[21].mxu1  ;;  %v925_v52 = vadd.f32 %v2410_v41, %v905_v38 }
 0x44a   :  { %v918_v0 = vadd.f32 %v866_v44, %v2375_v59  ;;  %v868_v1 = vpop.f32.mrb[30].mxu0  ;;  %v908_v45 = vpop.f32.mrb[22].mxu1 }
 0x44b   :  { %v1569_v37 = vmul.f32 -1.442695, %v911_v43  ;;  %v869_v57 = vpop.f32.mrb[31].mxu0  ;;  %v1766_v5 = vpop.f32.mrb[23].mxu1 }
 0x44c   :  { %v1570_v46 = vmul.f32 -1.442695, %v918_v0 }
 0x44d   :  { %1958 = vpow2.f32 %v1569_v37 }
 0x44e   :  { %1960 = vpow2.f32 %v1570_v46 }
 0x457   :  { %v1959_v12 = vpop.eup %1958 }
 0x458   :  { %v915_v18 = vadd.f32 1.0, %v1959_v12  ;;  %v1961_v48 = vpop.eup %1960 }
 0x459   :  { %v922_v54 = vadd.f32 1.0, %v1961_v48 }
 0x45a   :  { %1962 = vrcp.f32 %v915_v18 }
 0x464   :  { %v1963_v26 = vpop.eup %1962 }
 0x465   :  { %v926_v56 = vmul.f32 %v1963_v26, %v925_v52 }
 0x467   :  { %v927_v40 = vadd.f32 %v926_v56, %v2379_v63 }
 0x469   :  { %1964 = vtanh.f32 %v927_v40 }
 0x46a   :  { %1966 = vrcp.f32 %v922_v54  ;;  %v2593_v54 = vld [vmem:[#allocation6] ss:$12 sps:$4 sm:$0xff]  }
 0x473   :  { %v1965_v59 = vpop.eup %1964 }
 0x474   :  { %v929_v47 = vsub.f32 %v2501_v58, %v1965_v59  ;;  %v1967_v55 = vpop.eup %1966 }
 0x476   :  { %v930_v2 = vmul.f32 %v1967_v55, %v929_v47  ;;  %v2608_v47 = vld [vmem:[#allocation6 + $0x34] ss:$12 sps:$4 sm:$0xff]  }
 0x478   :  { %v2545_v42 = vadd.f32 %v1965_v59, %v930_v2  ;;  %v2604_v59 = vld [vmem:[#allocation6 + $0x18] ss:$12 sps:$4 sm:$0xff]  }
 0x47a   :  { %v939_v60 = vpack.c.bf16 %v2545_v42, %v2545_v42 }
 0x47c   :  { %973 = vmatmul.mubr.bf16.vlgmr.msra.gmra.mrb[32].mxu0 %v939_v60  ;;  %1784 = vmatmul.mubr.bf16.vlgmr.msra.gmra.mrb[24].mxu1 %v939_v60 }
 0x47d   :  { %1051 = vmatpush1.bf16.msra.mxu0 %v2226_v7  ;;  %1788 = vmatpush3.bf16.msra.mxu1 %v2251_v17 }
 0x47e   :  { %1052 = vmatprep.subr.bf16.mxu0 %v2229_v8  ;;  %1789 = vmatprep.subr.bf16.mxu1 %v2743_v51 }
 0x47f   :  { %1082 = vmatprep.mubr.bf16.mxu0 %v2744_v61  ;;  %1803 = vmatprep.mubr.msk.bf16.mxu1 %vm2134_vm1, %v2743_v51 }
 0x481   :  { %1053 = vmatpush1.bf16.msra.mxu0 %v2232_v9  ;;  %1790 = vmatpush3.bf16.msra.mxu1 %v2264_v21 }
 0x482   :  { %1054 = vmatprep.subr.bf16.mxu0 %v2237_v11  ;;  %1791 = vmatprep.subr.bf16.mxu1 %v2743_v51 }
 0x485   :  { %1055 = vmatpush1.bf16.msra.mxu0 %v2243_v14  ;;  %1792 = vmatpush3.bf16.msra.mxu1 %v2278_v25 }
 0x486   :  { %1056 = vmatprep.subr.bf16.mxu0 %v2246_v15  ;;  %1793 = vmatprep.subr.bf16.mxu1 %v2743_v51 }
 0x489   :  { %1057 = vmatpush1.bf16.msra.mxu0 %v2248_v16  ;;  %1794 = vmatpush3.bf16.msra.mxu1 %v2289_v28 }
 0x48a   :  { %1058 = vmatprep.subr.bf16.mxu0 %v2259_v19  ;;  %1795 = vmatprep.subr.bf16.mxu1 %v2743_v51 }
 0x48d   :  { %1059 = vmatpush1.bf16.msra.mxu0 %v2268_v22  ;;  %1796 = vmatpush3.bf16.msra.mxu1 %v2304_v31 }
 0x48e   :  { %1060 = vmatprep.subr.bf16.mxu0 %v2272_v23  ;;  %1797 = vmatprep.subr.bf16.mxu1 %v2743_v51 }
 0x491   :  { %1061 = vmatpush1.bf16.msra.mxu0 %v2274_v24  ;;  %1798 = vmatpush3.bf16.msra.mxu1 %v2313_v33 }
 0x492   :  { %1062 = vmatprep.subr.bf16.mxu0 %v2285_v27  ;;  %1799 = vmatprep.subr.bf16.mxu1 %v2743_v51 }
 0x495   :  { %1063 = vmatpush1.bf16.msra.mxu0 %v2291_v29  ;;  %1800 = vmatpush3.bf16.msra.mxu1 %v2320_v34 }
 0x496   :  { %1064 = vmatprep.subr.bf16.mxu0 %v2294_v30  ;;  %1801 = vmatprep.subr.bf16.mxu1 %v2743_v51 }
 0x499   :  { %1065 = vmatpush1.bf16.msra.mxu0 %v2307_v32  ;;  %1802 = vmatpush3.bf16.msra.mxu1 %v2327_v35 }
 0x49a   :  { %1160 = vmatprep.subr.bf16.mxu0 %v2223_v6  ;;  %1807 = vmatprep.subr.bf16.mxu1 %v2743_v51 }
 0x54f   :  { %v974_v7 = vpop.f32.mrb[32].mxu0  ;;  %v1015_v8 = vpop.f32.mrb[24].mxu1 }
 0x550   :  { %v1021_v9 = vadd.f32 %v974_v7, %v2383_v4  ;;  %v976_v11 = vpop.f32.mrb[33].mxu0  ;;  %v1785_v63 = vpop.f32.mrb[25].mxu1  ;;  %v1035_v5 = vadd.f32 %v2410_v41, %v1015_v8 }
 0x551   :  { %v1028_v38 = vadd.f32 %v976_v11, %v2385_v10  ;;  %v978_v43 = vpop.f32.mrb[34].mxu0  ;;  %v1018_v44 = vpop.f32.mrb[26].mxu1 }
 0x552   :  { %v1571_v20 = vmul.f32 -1.442695, %v1021_v9  ;;  %v979_v0 = vpop.f32.mrb[35].mxu0  ;;  %v1786_v1 = vpop.f32.mrb[27].mxu1 }
 0x553   :  { %v1572_v45 = vmul.f32 -1.442695, %v1028_v38  ;;  %v2021_v0 = vld [vmem:[#allocation6 + $0x30] ss:$12 sps:$4 sm:$0xff]   ;;  %v2022_v1 = vld [vmem:[#allocation6 + $0x38] ss:$12 sps:$4 sm:$0xff]  }
 0x554   :  { %1968 = vpow2.f32 %v1571_v20  ;;  %v2019_v20 = vld [vmem:[#allocation6 + $0x8] ss:$12 sps:$4 sm:$0xff]  }
 0x555   :  { %1970 = vpow2.f32 %v1572_v45  ;;  %v2023_v45 = vld [vmem:[#allocation6 + $0x4c] ss:$12 sps:$4 sm:$0xff]  }
 0x55e   :  { %v1969_v37 = vpop.eup %1968 }
 0x55f   :  { %v1025_v57 = vadd.f32 1.0, %v1969_v37  ;;  %v1971_v6 = vpop.eup %1970  ;;  %v2025_v37 = vld [vmem:[#allocation6 + $0x50] ss:$12 sps:$4 sm:$0xff]  }
 0x560   :  { %v1032_v18 = vadd.f32 1.0, %v1971_v6  ;;  %v2027_v6 = vld [vmem:[#allocation6 + $0x60] ss:$12 sps:$4 sm:$0xff]  }
 0x561   :  { %1972 = vrcp.f32 %v1025_v57  ;;  %v2026_v57 = vld [vmem:[#allocation6 + $0x64] ss:$12 sps:$4 sm:$0xff]  }
 0x56b   :  { %v1973_v46 = vpop.eup %1972 }
 0x56c   :  { %v1036_v4 = vmul.f32 %v1973_v46, %v1035_v5  ;;  %v2028_v5 = vld [vmem:[#allocation6 + $0x7c] ss:$12 sps:$4 sm:$0xff]   ;;  %v2029_v46 = vld [vmem:[#allocation6 + $0x78] ss:$12 sps:$4 sm:$0xff]  }
 0x56e   :  { %v1037_v12 = vadd.f32 %v1036_v4, %v2393_v39  ;;  %v2597_v39 = vld [vmem:[#allocation6 + $0x1c] ss:$12 sps:$4 sm:$0xff]   ;;  %v2030_v4 = vld [vmem:[#allocation6 + $0x94] ss:$12 sps:$4 sm:$0xff]  }
 0x570   :  { %1974 = vtanh.f32 %v1037_v12  ;;  %v2031_v12 = vld [vmem:[#allocation6 + $0x90] ss:$12 sps:$4 sm:$0xff]  }
 0x571   :  { %1976 = vrcp.f32 %v1032_v18  ;;  %v2032_v18 = vld [vmem:[#allocation6 + $0xac] ss:$12 sps:$4 sm:$0xff]  }
 0x57a   :  { %v1975_v10 = vpop.eup %1974 }
 0x57b   :  { %v1039_v48 = vsub.f32 %v2545_v42, %v1975_v10  ;;  %v1977_v52 = vpop.eup %1976 }
 0x57d   :  { %v1040_v26 = vmul.f32 %v1977_v52, %v1039_v48 }
 0x57f   :  { %v2589_v56 = vadd.f32 %v1975_v10, %v1040_v26  ;;  %v2745_v26 = vld [vmem:[#allocation15_spill] sm:$0xff] }
 0x581   :  { %v1049_v40 = vpack.c.bf16 %v2589_v56, %v2589_v56 }
 0x583   :  { %1083 = vmatmul.mubr.bf16.vlgmr.msra.gmra.mrb[36].mxu0 %v1049_v40  ;;  %1804 = vmatmul.mubr.bf16.vlgmr.msra.gmra.mrb[28].mxu1 %v1049_v40 }
 0x584   :  { %1161 = vmatpush1.bf16.msra.mxu0 %v2593_v54  ;;  %1808 = vmatpush3.bf16.msra.mxu1 %v2251_v17 }
 0x585   :  { %1162 = vmatprep.subr.bf16.mxu0 %v2597_v39  ;;  %1809 = vmatprep.subr.bf16.mxu1 %v2743_v51 }
 0x586   :  { %1192 = vmatprep.mubr.bf16.mxu0 %v2744_v61  ;;  %1823 = vmatprep.mubr.msk.bf16.mxu1 %vm2134_vm1, %v2743_v51 }
 0x588   :  { %1163 = vmatpush1.bf16.msra.mxu0 %v2604_v59  ;;  %1810 = vmatpush3.bf16.msra.mxu1 %v2264_v21 }
 0x589   :  { %1164 = vmatprep.subr.bf16.mxu0 %v2608_v47  ;;  %1811 = vmatprep.subr.bf16.mxu1 %v2743_v51 }
 0x58c   :  { %1165 = vmatpush1.bf16.msra.mxu0 %v2243_v14  ;;  %1812 = vmatpush3.bf16.msra.mxu1 %v2278_v25  ;;  %v2018_v14 = vld [vmem:[#allocation6 + $0x4] ss:$12 sps:$4 sm:$0xff]  }
 0x58d   :  { %1166 = vmatprep.subr.bf16.mxu0 %v2246_v15  ;;  %1813 = vmatprep.subr.bf16.mxu1 %v2743_v51 }
 0x590   :  { %1167 = vmatpush1.bf16.msra.mxu0 %v2248_v16  ;;  %1814 = vmatpush3.bf16.msra.mxu1 %v2289_v28 }
 0x591   :  { %1168 = vmatprep.subr.bf16.mxu0 %v2259_v19  ;;  %1815 = vmatprep.subr.bf16.mxu1 %v2743_v51 }
 0x594   :  { %1169 = vmatpush1.bf16.msra.mxu0 %v2268_v22  ;;  %1816 = vmatpush3.bf16.msra.mxu1 %v2304_v31 }
 0x595   :  { %1170 = vmatprep.subr.bf16.mxu0 %v2272_v23  ;;  %1817 = vmatprep.subr.bf16.mxu1 %v2743_v51 }
 0x598   :  { %1171 = vmatpush1.bf16.msra.mxu0 %v2274_v24  ;;  %1818 = vmatpush3.bf16.msra.mxu1 %v2313_v33 }
 0x599   :  { %1172 = vmatprep.subr.bf16.mxu0 %v2285_v27  ;;  %1819 = vmatprep.subr.bf16.mxu1 %v2743_v51 }
 0x59c   :  { %1173 = vmatpush1.bf16.msra.mxu0 %v2291_v29  ;;  %1820 = vmatpush3.bf16.msra.mxu1 %v2320_v34 }
 0x59d   :  { %1174 = vmatprep.subr.bf16.mxu0 %v2294_v30  ;;  %1821 = vmatprep.subr.bf16.mxu1 %v2743_v51 }
 0x5a0   :  { %1175 = vmatpush1.bf16.msra.mxu0 %v2307_v32  ;;  %1822 = vmatpush3.bf16.msra.mxu1 %v2327_v35 }
 0x5a1   :  { %1270 = vmatprep.subr.bf16.mxu0 %v2018_v14  ;;  %1827 = vmatprep.subr.bf16.mxu1 %v2743_v51 }
 0x656   :  { %v1084_v15 = vpop.f32.mrb[36].mxu0  ;;  %v1125_v16 = vpop.f32.mrb[28].mxu1 }
 0x657   :  { %v1131_v17 = vadd.f32 %v1084_v15, %v2387_v13  ;;  %v1086_v19 = vpop.f32.mrb[37].mxu0  ;;  %v1805_v21 = vpop.f32.mrb[29].mxu1  ;;  %v1145_v60 = vadd.f32 %v2410_v41, %v1125_v16 }
 0x658   :  { %v1138_v22 = vadd.f32 %v1086_v19, %v2389_v36  ;;  %v1088_v23 = vpop.f32.mrb[38].mxu0  ;;  %v1128_v24 = vpop.f32.mrb[30].mxu1  ;;  %v2746_v19 = vld [vmem:[#allocation13_spill] sm:$0xff] }
 0x659   :  { %v1573_v25 = vmul.f32 -1.442695, %v1131_v17  ;;  %v1089_v27 = vpop.f32.mrb[39].mxu0  ;;  %v1806_v28 = vpop.f32.mrb[31].mxu1 }
 0x65a   :  { %v1574_v29 = vmul.f32 -1.442695, %v1138_v22 }
 0x65b   :  { %1978 = vpow2.f32 %v1573_v25 }
 0x65c   :  { %1980 = vpow2.f32 %v1574_v29 }
 0x665   :  { %v1979_v30 = vpop.eup %1978 }
 0x666   :  { %v1135_v55 = vadd.f32 1.0, %v1979_v30  ;;  %v1981_v2 = vpop.eup %1980  ;;  %v1920_v30 = vld [vmem:[%s2732_s5] sm:$0xff]  }
 0x667   :  { %v1142_v9 = vadd.f32 1.0, %v1981_v2  ;;  %v1922_v2 = vld [vmem:[%s2732_s5 + $0x10] sm:$0xff]  }
 0x668   :  { %1982 = vrcp.f32 %v1135_v55  ;;  %v1921_v55 = vld [vmem:[%s2732_s5 + $0x8] sm:$0xff]  }
 0x672   :  { %v1983_v7 = vpop.eup %1982 }
 0x673   :  { %v1146_v13 = vmul.f32 %v1983_v7, %v1145_v60  ;;  %v1923_v60 = vld [vmem:[%s2732_s5 + $0x18] sm:$0xff]   ;;  %v1924_v7 = vld [vmem:[%s2732_s5 + $0x20] sm:$0xff]  }
 0x675   :  { %v1147_v8 = vadd.f32 %v1146_v13, %v2397_v49  ;;  %v2020_v49 = vld [vmem:[#allocation6 + $0x20] ss:$12 sps:$4 sm:$0xff]   ;;  %v1925_v13 = vld [vmem:[%s2732_s5 + $0x28] sm:$0xff]  }
 0x677   :  { %1984 = vtanh.f32 %v1147_v8  ;;  %v1926_v8 = vld [vmem:[%s2732_s5 + $0x30] sm:$0xff]  }
 0x678   :  { %1986 = vrcp.f32 %v1142_v9  ;;  %v1927_v9 = vld [vmem:[%s2732_s5 + $0x38] sm:$0xff]  }
 0x681   :  { %v1985_v36 = vpop.eup %1984 }
 0x682   :  { %v1149_v11 = vsub.f32 %v2589_v56, %v1985_v36  ;;  %v1987_v63 = vpop.eup %1986 }
 0x684   :  { %v1150_v38 = vmul.f32 %v1987_v63, %v1149_v11  ;;  %v2747_v63 = vld [vmem:[#allocation16_spill] sm:$0xff] }
 0x686   :  { %v2640_v43 = vadd.f32 %v1985_v36, %v1150_v38 }
 0x688   :  { %v1159_v44 = vpack.c.bf16 %v2640_v43, %v2640_v43 }
 0x68a   :  { %1193 = vmatmul.mubr.bf16.vlgmr.msra.gmra.mrb[40].mxu0 %v1159_v44  ;;  %1824 = vmatmul.mubr.bf16.vlgmr.msra.gmra.mrb[32].mxu1 %v1159_v44 }
 0x68b   :  { %1271 = vmatpush1.bf16.msra.mxu0 %v2593_v54  ;;  %1828 = vmatpush3.bf16.msra.mxu1 %v2019_v20 }
 0x68c   :  { %1272 = vmatprep.subr.bf16.mxu0 %v2597_v39  ;;  %1829 = vmatprep.subr.bf16.mxu1 %v2743_v51 }
 0x68d   :  { %1302 = vmatprep.mubr.bf16.mxu0 %v2744_v61  ;;  %1843 = vmatprep.mubr.msk.bf16.mxu1 %vm2134_vm1, %v2743_v51  ;;  %v2024_v61 = vld [vmem:[#allocation6 + $0x48] ss:$12 sps:$4 sm:$0xff]  }
 0x68f   :  { %1273 = vmatpush1.bf16.msra.mxu0 %v2604_v59  ;;  %1830 = vmatpush3.bf16.msra.mxu1 %v2020_v49 }
 0x690   :  { %1274 = vmatprep.subr.bf16.mxu0 %v2608_v47  ;;  %1831 = vmatprep.subr.bf16.mxu1 %v2743_v51 }
 0x693   :  { %1275 = vmatpush1.bf16.msra.mxu0 %v2021_v0  ;;  %1832 = vmatpush3.bf16.msra.mxu1 %v2022_v1 }
 0x694   :  { %1276 = vmatprep.subr.bf16.mxu0 %v2023_v45  ;;  %1833 = vmatprep.subr.bf16.mxu1 %v2743_v51 }
 0x697   :  { %1277 = vmatpush1.bf16.msra.mxu0 %v2024_v61  ;;  %1834 = vmatpush3.bf16.msra.mxu1 %v2025_v37 }
 0x698   :  { %1278 = vmatprep.subr.bf16.mxu0 %v2026_v57  ;;  %1835 = vmatprep.subr.bf16.mxu1 %v2743_v51 }
 0x69b   :  { %1279 = vmatpush1.bf16.msra.mxu0 %v2027_v6  ;;  %1836 = vmatpush3.bf16.msra.mxu1 %v2304_v31 }
 0x69c   :  { %1280 = vmatprep.subr.bf16.mxu0 %v2028_v5  ;;  %1837 = vmatprep.subr.bf16.mxu1 %v2743_v51 }
 0x69f   :  { %1281 = vmatpush1.bf16.msra.mxu0 %v2029_v46  ;;  %1838 = vmatpush3.bf16.msra.mxu1 %v2313_v33 }
 0x6a0   :  { %1282 = vmatprep.subr.bf16.mxu0 %v2030_v4  ;;  %1839 = vmatprep.subr.bf16.mxu1 %v2743_v51 }
 0x6a3   :  { %1283 = vmatpush1.bf16.msra.mxu0 %v2031_v12  ;;  %1840 = vmatpush3.bf16.msra.mxu1 %v2320_v34 }
 0x6a4   :  { %1284 = vmatprep.subr.bf16.mxu0 %v2032_v18  ;;  %1841 = vmatprep.subr.bf16.mxu1 %v2743_v51  ;;  %v2748_v18 = vld [vmem:[#allocation14_spill] sm:$0xff] }
 0x6a7   :  { %1285 = vmatpush1.bf16.msra.mxu0 %v2307_v32  ;;  %1842 = vmatpush3.bf16.msra.mxu1 %v2327_v35 }
 0x6a8   :  { %1847 = vmatprep.subr.bf16.mxu0 %v2743_v51 }
 0x75d   :  { %v1194_v31 = vpop.f32.mrb[40].mxu0  ;;  %v1235_v33 = vpop.f32.mrb[32].mxu1 }
 0x75e   :  { %v1241_v10 = vadd.f32 %v1194_v31, %v2399_v53  ;;  %v1196_v48 = vpop.f32.mrb[41].mxu0  ;;  %v1825_v52 = vpop.f32.mrb[33].mxu1  ;;  %v1255_v16 = vadd.f32 %v2410_v41, %v1235_v33 }
 0x75f   :  { %v1248_v40 = vadd.f32 %v1196_v48, %v2745_v26  ;;  %v1198_v54 = vpop.f32.mrb[42].mxu0  ;;  %v1238_v34 = vpop.f32.mrb[34].mxu1 }
 0x760   :  { %v1575_v39 = vmul.f32 -1.442695, %v1241_v10  ;;  %v1199_v59 = vpop.f32.mrb[43].mxu0  ;;  %v1826_v47 = vpop.f32.mrb[35].mxu1 }
 0x761   :  { %v1576_v14 = vmul.f32 -1.442695, %v1248_v40 }
 0x762   :  { %1988 = vpow2.f32 %v1575_v39 }
 0x763   :  { %1990 = vpow2.f32 %v1576_v14 }
 0x76c   :  { %v1989_v32 = vpop.eup %1988 }
 0x76d   :  { %v1245_v15 = vadd.f32 1.0, %v1989_v32  ;;  %v1991_v35 = vpop.eup %1990 }
 0x76e   :  { %v1252_v22 = vadd.f32 1.0, %v1991_v35 }
 0x76f   :  { %1992 = vrcp.f32 %v1245_v15 }
 0x779   :  { %v1993_v17 = vpop.eup %1992 }
 0x77a   :  { %v1256_v53 = vmul.f32 %v1993_v17, %v1255_v16 }
 0x77c   :  { %v1257_v21 = vadd.f32 %v1256_v53, %v2746_v19 }
 0x77e   :  { %1994 = vtanh.f32 %v1257_v21 }
 0x77f   :  { %1996 = vrcp.f32 %v1252_v22 }
 0x788   :  { %v1995_v23 = vpop.eup %1994 }
 0x789   :  { %v1259_v24 = vsub.f32 %v2640_v43, %v1995_v23  ;;  %v1997_v25 = vpop.eup %1996 }
 0x78b   :  { %v1260_v27 = vmul.f32 %v1997_v25, %v1259_v24 }
 0x78d   :  { %v1261_v28 = vadd.f32 %v1995_v23, %v1260_v27 }
 0x78f   :  { %v1269_v29 = vpack.c.bf16 %v1261_v28, %v1261_v28 }
 0x791   :  { %1303 = vmatmul.mubr.bf16.vlgmr.msra.gmra.mrb[44].mxu0 %v1269_v29  ;;  %1844 = vmatmul.mubr.bf16.vlgmr.msra.gmra.mrb[36].mxu1 %v1269_v29 }
 0x792   :  { %1863 = vmatprep.mubr.msk.bf16.mxu0 %vm2134_vm1, %v2743_v51  ;;  %1848 = vmatpush3.bf16.msra.mxu0 %v1920_v30 }
 0x793   :  { %1849 = vmatprep.subr.bf16.mxu0 %v2743_v51 }
 0x796   :  { %1850 = vmatpush3.bf16.msra.mxu0 %v1921_v55 }
 0x797   :  { %1851 = vmatprep.subr.bf16.mxu0 %v2743_v51 }
 0x79a   :  { %1852 = vmatpush3.bf16.msra.mxu0 %v1922_v2 }
 0x79b   :  { %1853 = vmatprep.subr.bf16.mxu0 %v2743_v51 }
 0x79e   :  { %1854 = vmatpush3.bf16.msra.mxu0 %v1923_v60 }
 0x79f   :  { %1855 = vmatprep.subr.bf16.mxu0 %v2743_v51 }
 0x7a2   :  { %1856 = vmatpush3.bf16.msra.mxu0 %v1924_v7 }
 0x7a3   :  { %1857 = vmatprep.subr.bf16.mxu0 %v2743_v51 }
 0x7a6   :  { %1858 = vmatpush3.bf16.msra.mxu0 %v1925_v13 }
 0x7a7   :  { %1859 = vmatprep.subr.bf16.mxu0 %v2743_v51 }
 0x7aa   :  { %1860 = vmatpush3.bf16.msra.mxu0 %v1926_v8 }
 0x7ab   :  { %1861 = vmatprep.subr.bf16.mxu0 %v2743_v51 }
 0x7ae   :  { %1862 = vmatpush3.bf16.msra.mxu0 %v1927_v9 }
 0x864   :  { %v1304_v36 = vpop.f32.mrb[44].mxu0  ;;  %v1345_v11 = vpop.f32.mrb[36].mxu1 }
 0x865   :  { %v1351_v38 = vadd.f32 %v1304_v36, %v2747_v63  ;;  %v1306_v44 = vpop.f32.mrb[45].mxu0  ;;  %v1845_v20 = vpop.f32.mrb[37].mxu1  ;;  %v1365_v46 = vadd.f32 %v2410_v41, %v1345_v11 }
 0x866   :  { %v1358_v49 = vadd.f32 %v1306_v44, %v2405_v3  ;;  %v1308_v0 = vpop.f32.mrb[46].mxu0  ;;  %v1348_v1 = vpop.f32.mrb[38].mxu1  ;;  %v712_v3 = vadd.f32 %v2457_v50, %v2413_v62  ;;  %v1579_v62 = vld [vmem:[%s2733_s6] ss:$0 sm:$0xff]  ;;  %s2099_s6 = scalar_lea.vmem %s1504_s14, 128 }
 0x867   :  { %v1577_v45 = vmul.f32 -1.442695, %v1351_v38  ;;  %v1309_v61 = vpop.f32.mrb[47].mxu0  ;;  %v1846_v37 = vpop.f32.mrb[39].mxu1  ;;  %p2100_p10 = scmp.ne.s32.totalorder %s1504_s14, %s2099_s6  ;;  %p2105_p12 = scmp.lt.s32.totalorder %s2099_s6, %s2099_s6 }
 0x868   :  { %v1578_v57 = vmul.f32 -1.442695, %v1358_v49  ;;  %v822_v10 = vadd.f32 %v2501_v58, %v712_v3 }
 0x869   :  { %1998 = vpow2.f32 %v1577_v45  ;;  %p2106_p13 = por %p2105_p12, %p2104_p11 }
 0x86a   :  { %2000 = vpow2.f32 %v1578_v57  ;;  %v932_v48 = vadd.f32 %v2545_v42, %v822_v10 }
 0x86b   :  { %p2107_p0 = pnand %p2106_p13, %p2100_p10 }
 0x86c   :  { %v1042_v26 = vadd.f32 %v2589_v56, %v932_v48 }
 0x86e   :  { %v1152_v41 = vadd.f32 %v2640_v43, %v1042_v26 }
 0x870   :  { %v1262_v39 = vadd.f32 %v1261_v28, %v1152_v41 }
 0x873   :  { %v1999_v6 = vpop.eup %1998 }
 0x874   :  { %v1355_v5 = vadd.f32 1.0, %v1999_v6  ;;  %v2001_v51 = vpop.eup %2000 }
 0x875   :  { %v1362_v33 = vadd.f32 1.0, %v2001_v51 }
 0x876   :  { %2002 = vrcp.f32 %v1355_v5 }
 0x880   :  { %v2003_v4 = vpop.eup %2002 }
 0x881   :  { %v1366_v12 = vmul.f32 %v2003_v4, %v1365_v46 }
 0x883   :  { %v1367_v31 = vadd.f32 %v1366_v12, %v2748_v18 }
 0x885   :  { %2004 = vtanh.f32 %v1367_v31 }
 0x886   :  { %2006 = vrcp.f32 %v1362_v33 }
 0x88f   :  { %v2005_v52 = vpop.eup %2004 }
 0x890   :  { %v1369_v40 = vsub.f32 %v1261_v28, %v2005_v52  ;;  %v2007_v54 = vpop.eup %2006 }
 0x892   :  { %v1370_v34 = vmul.f32 %v2007_v54, %v1369_v40 }
 0x894   :  { %v1371_v59 = vadd.f32 %v2005_v52, %v1370_v34 }
 0x896   :  { %v1372_v47 = vadd.f32 %v1371_v59, %v1262_v39 }
 0x898   :  { %2008 = vtanh.f32 %v1372_v47 }
 0x8a2   :  { %v2009_v14 = vpop.eup %2008 }
 0x8a3   :  { %v1374_v32 = vpack.c.bf16 %v2009_v14, %v2009_v14 }
 0x8a5   :  { %1864 = vmatmul.mubr.bf16.vlgmr.msra.gmra.mrb[48].mxu0 %v1374_v32 }
 0x978   :  { %v1480_v50 = vpop.f32.mrb[48].mxu0 }
 0x979   :  { %v1481_v58 = vadd.f32 %v1579_v62, %v1480_v50  ;;  %v1865_v42 = vpop.f32.mrb[49].mxu0 }
 0x97a   :  { %v1483_v56 = vpop.f32.mrb[50].mxu0 }
 0x97b   :  { %1486 = vmax.xlane.f32.xlu0 %v1481_v58  ;;  %v1866_v15 = vpop.f32.mrb[51].mxu0 }
 0xa08   :  { %v1487_v35 = vpop.xlane.xlu0 %1486 }
 0xa09   :  { %v1488_v43 = vsub.f32 %v1481_v58, %v1487_v35 }
 0xa0b   :  { %v1489_v16 = vmul.f32 1.442695, %v1488_v43 }
 0xa0d   :  { %2010 = vpow2.f32 %v1489_v16 }
 0xa17   :  { %v2011_v17 = vpop.eup %2010 }
 0xa18   :  { %1491 = vadd.xlane.f32.xlu0 %v2011_v17 }
 0xaa5   :  { %v1492_v53 = vpop.xlane.xlu0 %1491 }
 0xaa6   :  { %2012 = vlog2.f32 %v1492_v53 }
 0xab0   :  { %v2013_v19 = vpop.eup %2012 }
 0xab1   :  { %v1494_v21 = vmul.f32 0.6931472, %v2013_v19 }
 0xab3   :  { %v1495_v22 = vsub.f32 %v1488_v43, %v1494_v21 }
 0xab5   :  { %1496 = vst [vmem:[#allocation9] sm:$0xff] %v1495_v22 }
 0xab6   :  { %2110 = shalt.err (!%p2107_p0)
}
 0xab7   :  { %s2111_s17 = scalar_lea.hbm %s2734_s7, 128 }
 0xab8   :  { %p2112_p1 = scmp.ne.s32.totalorder %s2734_s7, %s2111_s17  ;;  %p2115_p2 = scmp.lt.u32.totalorder %s2111_s17, %s2734_s7 }
 0xaba   :  { %p2117_p3 = pnand %p2115_p2, %p2112_p1 }
 0xabc   :  { %2120 = shalt.err (!%p2117_p3)
}
 0xabd   :  { %1506 = dma.vmem_to_hbm [thread:$0]  %s1504_s14, 128, %s2734_s7, [#allocation5]  }
 0xabe   :  { %2125 = dma.done.wait [#allocation5], 128  }
 0xabf   :  { %2126 = vsyncadd [#allocation5], 4294967168 }
 0xac0   :  { %1510 = vsyncpa [#allocation4], 1 }
 0xac1   :  { %1511 = vsyncpa [#allocation7], 1 }
 0xac2   :  { %1512 = vsyncpa [#allocation5], 1 }

</bundles_post_ra>
